<compile_context>
chip_gen: v7x
topology: tpu7x:2x2x1
jax: 0.10.0
libtpu: 0.0.40
codegen_flags: <defaults>
</compile_context>

<pallas_src>
import functools

import jax
import jax.numpy as jnp
from jax import lax
from jax.experimental import pallas as pl
from jax.experimental.pallas import tpu as pltpu

_SOBEL_X = ((-1.0, 0.0, 1.0), (-2.0, 0.0, 2.0), (-1.0, 0.0, 1.0))
_SOBEL_Y = ((-1.0, -2.0, -1.0), (0.0, 0.0, 0.0), (1.0, 2.0, 1.0))


def _sobel_edges(x):
    """edge_x, edge_y via 3x3 cross-correlation with zero padding=1 (== F.conv2d)."""
    B, C, H, W = x.shape
    xp = jnp.pad(x, ((0, 0), (0, 0), (1, 1), (1, 1)))
    ex = jnp.zeros_like(x)
    ey = jnp.zeros_like(x)
    for u in range(3):
        for v in range(3):
            patch = xp[:, :, u:u + H, v:v + W]
            if _SOBEL_X[u][v] != 0.0:
                ex = ex + _SOBEL_X[u][v] * patch
            if _SOBEL_Y[u][v] != 0.0:
                ey = ey + _SOBEL_Y[u][v] * patch
    return ex, ey


def _window_values(t, ws):
    """(B, C, H, W) -> (Hw, Ww, B*C*ws*ws, 1): all values of one window (batch and
    channel combined, mirroring torch.histc over the whole window slab) along the
    sublane axis of the kernel block."""
    B, C, H, W = t.shape
    hw, wwn = H // ws, W // ws
    t = t.reshape(B, C, hw, ws, wwn, ws)
    t = jnp.transpose(t, (2, 4, 0, 1, 3, 5))           # (Hw, Ww, B, C, ws, ws)
    return t.reshape(hw, wwn, B * C * ws * ws, 1)


def _range_stats(t, bins):
    """torch.histc range: global min and bins/(max-min) (guarded against max==min)."""
    mn = jnp.min(t).astype(jnp.float32)
    mx = jnp.max(t).astype(jnp.float32)
    rng = mx - mn
    scale = jnp.float32(bins) / jnp.where(rng > 0, rng, jnp.float32(1.0))
    return mn, scale


def _edge_hist_kernel(stats_ref, mag_ref, dir_ref, out_ref, *, bins, n_windows_w):
    # stats_ref: SMEM (4,) f32 = [mag_min, mag_scale, dir_min, dir_scale]
    # mag_ref / dir_ref: VMEM (1, Ww, n_vals, 1) window values for this row of windows
    # out_ref: VMEM (1, Ww, bins) summed histograms (lane-dense, bins on lanes)
    m_min, m_scale = stats_ref[0], stats_ref[1]
    d_min, d_scale = stats_ref[2], stats_ref[3]
    bin_ids = lax.broadcasted_iota(jnp.int32, (1, bins), 1)

    def _hist(vals, mn, scale):
        # torch.histc: idx = floor((v - min) * bins / (max - min)); v == max -> last bin.
        idx = jnp.floor((vals - mn) * scale).astype(jnp.int32)      # (n_vals, 1)
        idx = jnp.clip(idx, 0, bins - 1)
        onehot = (idx == bin_ids).astype(jnp.float32)               # (n_vals, bins)
        return jnp.sum(onehot, axis=0, keepdims=True)               # (1, bins)

    for j in range(n_windows_w):
        m = mag_ref[0, j]                                           # (n_vals, 1)
        d = dir_ref[0, j]
        h = _hist(m, m_min, m_scale) + _hist(d, d_min, d_scale)     # (1, bins)
        out_ref[:, pl.ds(j, 1), :] = h.reshape(1, 1, bins)


def compute_edge_attributes(x, *, window_size=8, bins=256):
    """Forward pass of ComputeEdgeAttributes(window_size) for x of shape (B, 1, H, W)."""
    B, C, H, W = x.shape
    assert C == 1, "Sobel weights are (1,1,3,3): input must have a single channel"
    assert H % window_size == 0 and W % window_size == 0
    hw, wwn = H // window_size, W // window_size
    n_vals = B * C * window_size * window_size

    # Edge maps + global histogram ranges (plain JAX; see TODO(synk) in header).
    ex, ey = _sobel_edges(x)
    mag = jnp.sqrt(ex * ex + ey * ey)
    dirn = jnp.arctan2(ey, ex)
    m_min, m_scale = _range_stats(mag, bins)
    d_min, d_scale = _range_stats(dirn, bins)
    stats = jnp.stack([m_min, m_scale, d_min, d_scale])             # (4,) f32 -> SMEM

    win_mag = _window_values(mag, window_size)                      # (Hw, Ww, n_vals, 1)
    win_dir = _window_values(dirn, window_size)

    kernel = functools.partial(_edge_hist_kernel, bins=bins, n_windows_w=wwn)

    flops = int(4 * hw * wwn * n_vals * bins)
    bytes_accessed = int(2 * hw * wwn * n_vals * 4 + hw * wwn * bins * 4 + 16)

    hist = pl.pallas_call(
        kernel,
        out_shape=jax.ShapeDtypeStruct((hw, wwn, bins), jnp.float32),
        grid_spec=pltpu.PrefetchScalarGridSpec(
            num_scalar_prefetch=0,
            grid=(hw,),                                             # one row of windows per step
            in_specs=[
                pl.BlockSpec(memory_space=pltpu.SMEM),              # range scalars
                pl.BlockSpec((1, wwn, n_vals, 1), lambda i: (i, 0, 0, 0)),
                pl.BlockSpec((1, wwn, n_vals, 1), lambda i: (i, 0, 0, 0)),
            ],
            out_specs=pl.BlockSpec((1, wwn, bins), lambda i: (i, 0, 0)),
        ),
        compiler_params=pltpu.CompilerParams(
            dimension_semantics=("parallel",),
        ),
        cost_estimate=pl.CostEstimate(
            flops=flops, transcendentals=0, bytes_accessed=bytes_accessed),
    )(stats, win_mag, win_dir)

    # PyTorch writes the same (batch-combined) histogram to every batch index.
    return jnp.broadcast_to(hist[None], (B, hw, wwn, bins))


def _reference_edge_attributes(x, *, window_size=8, bins=256):
    """Pure-JAX mirror of the PyTorch module (same histc binning semantics)."""
    ex, ey = _sobel_edges(x)
    mag = jnp.sqrt(ex * ex + ey * ey)
    dirn = jnp.arctan2(ey, ex)
    B = x.shape[0]
    hw, wwn = x.shape[2] // window_size, x.shape[3] // window_size

    def hists(t):
        mn, scale = _range_stats(t, bins)
        vals = _window_values(t, window_size)[..., 0]               # (hw, wwn, n_vals)
        idx = jnp.clip(jnp.floor((vals - mn) * scale).astype(jnp.int32), 0, bins - 1)
        onehot = (idx[..., None] == jnp.arange(bins)).astype(jnp.float32)
        h = jnp.sum(onehot, axis=2)                                 # (hw, wwn, bins)
        return jnp.broadcast_to(h[None], (B, hw, wwn, bins))

    return hists(mag) + hists(dirn)


if __name__ == "__main__":
    key = jax.random.PRNGKey(0)
    x = jax.random.normal(key, (2, 1, 16, 16), dtype=jnp.float32)

    fwd = jax.jit(lambda t: compute_edge_attributes(t, window_size=8, bins=256))
    out = jax.block_until_ready(fwd(x))

    ref = _reference_edge_attributes(x, window_size=8, bins=256)
    assert out.shape == (2, 2, 2, 256), out.shape
    assert jnp.allclose(out, ref, rtol=0.0, atol=1e-5), float(
        jnp.max(jnp.abs(out - ref)))
    # Each output histogram counts 2 full window slabs (magnitude + direction).
    n_vals = 2 * 1 * 8 * 8
    assert jnp.allclose(jnp.sum(out, axis=-1), 2.0 * n_vals)
    print("KERNEL_OK")
</pallas_src>

<mosaic_0001>
module attributes {stable_mosaic.version = 11 : i64} {
  func.func @_edge_hist_kernel(%arg0: i32, %arg1: memref<4xf32, #tpu.memory_space<smem>>, %arg2: memref<1x2x128x1xf32, #tpu.memory_space<vmem>>, %arg3: memref<1x2x128x1xf32, #tpu.memory_space<vmem>>, %arg4: memref<1x2x256xf32, #tpu.memory_space<vmem>>) attributes {dimension_semantics = [#tpu.dimension_semantics<parallel>], iteration_bounds = array<i64: 2>, scalar_prefetch = 0 : i64, scratch_operands = 0 : i64, tpu.core_type = #tpu.core_type<tc>, window_params = [{transform_indices = @transform_0, window_bounds = array<i64: 4>}, {transform_indices = @transform_1, window_bounds = array<i64: 1, 2, 128, 1>}, {transform_indices = @transform_2, window_bounds = array<i64: 1, 2, 128, 1>}, {transform_indices = @transform_3, window_bounds = array<i64: 1, 2, 256>}]} {
    %c0 = arith.constant 0 : index
    %0 = memref.load %arg1[%c0] : memref<4xf32, #tpu.memory_space<smem>>
    %c1 = arith.constant 1 : index
    %1 = memref.load %arg1[%c1] : memref<4xf32, #tpu.memory_space<smem>>
    %c2 = arith.constant 2 : index
    %2 = memref.load %arg1[%c2] : memref<4xf32, #tpu.memory_space<smem>>
    %c3 = arith.constant 3 : index
    %3 = memref.load %arg1[%c3] : memref<4xf32, #tpu.memory_space<smem>>
    %4 = tpu.iota {dimensions = array<i32: 1>} : vector<1x256xi32>
    %c0_0 = arith.constant 0 : index
    %c0_1 = arith.constant 0 : index
    %c0_2 = arith.constant 0 : index
    %c0_3 = arith.constant 0 : index
    %5 = vector.load %arg2[%c0_0, %c0_1, %c0_2, %c0_3] : memref<1x2x128x1xf32, #tpu.memory_space<vmem>>, vector<1x1x128x1xf32>
    %6 = vector.shape_cast %5 : vector<1x1x128x1xf32> to vector<128x1xf32>
    %c0_4 = arith.constant 0 : index
    %c0_5 = arith.constant 0 : index
    %c0_6 = arith.constant 0 : index
    %c0_7 = arith.constant 0 : index
    %7 = vector.load %arg3[%c0_4, %c0_5, %c0_6, %c0_7] : memref<1x2x128x1xf32, #tpu.memory_space<vmem>>, vector<1x1x128x1xf32>
    %8 = vector.shape_cast %7 : vector<1x1x128x1xf32> to vector<128x1xf32>
    %9 = vector.broadcast %0 : f32 to vector<128x1xf32>
    %10 = arith.subf %6, %9 : vector<128x1xf32>
    %11 = vector.broadcast %1 : f32 to vector<128x1xf32>
    %12 = arith.mulf %10, %11 : vector<128x1xf32>
    %13 = math.floor %12 : vector<128x1xf32>
    %14 = arith.fptosi %13 : vector<128x1xf32> to vector<128x1xi32>
    %c0_i32 = arith.constant 0 : i32
    %c255_i32 = arith.constant 255 : i32
    %15 = vector.broadcast %c0_i32 : i32 to vector<128x1xi32>
    %16 = arith.maxsi %15, %14 : vector<128x1xi32>
    %17 = vector.broadcast %c255_i32 : i32 to vector<128x1xi32>
    %18 = arith.minsi %17, %16 : vector<128x1xi32>
    %19 = vector.broadcast %18 : vector<128x1xi32> to vector<128x256xi32>
    %20 = vector.broadcast %4 : vector<1x256xi32> to vector<128x256xi32>
    %21 = arith.cmpi eq, %19, %20 : vector<128x256xi32>
    %22 = arith.extui %21 : vector<128x256xi1> to vector<128x256xi32>
    %23 = arith.sitofp %22 : vector<128x256xi32> to vector<128x256xf32>
    %cst = arith.constant dense<0.000000e+00> : vector<256xf32>
    %24 = vector.multi_reduction <add>, %23, %cst [0] : vector<128x256xf32> to vector<256xf32>
    %25 = vector.shape_cast %24 : vector<256xf32> to vector<1x256xf32>
    %26 = vector.broadcast %2 : f32 to vector<128x1xf32>
    %27 = arith.subf %8, %26 : vector<128x1xf32>
    %28 = vector.broadcast %3 : f32 to vector<128x1xf32>
    %29 = arith.mulf %27, %28 : vector<128x1xf32>
    %30 = math.floor %29 : vector<128x1xf32>
    %31 = arith.fptosi %30 : vector<128x1xf32> to vector<128x1xi32>
    %c0_i32_8 = arith.constant 0 : i32
    %c255_i32_9 = arith.constant 255 : i32
    %32 = vector.broadcast %c0_i32_8 : i32 to vector<128x1xi32>
    %33 = arith.maxsi %32, %31 : vector<128x1xi32>
    %34 = vector.broadcast %c255_i32_9 : i32 to vector<128x1xi32>
    %35 = arith.minsi %34, %33 : vector<128x1xi32>
    %36 = vector.broadcast %35 : vector<128x1xi32> to vector<128x256xi32>
    %37 = vector.broadcast %4 : vector<1x256xi32> to vector<128x256xi32>
    %38 = arith.cmpi eq, %36, %37 : vector<128x256xi32>
    %39 = arith.extui %38 : vector<128x256xi1> to vector<128x256xi32>
    %40 = arith.sitofp %39 : vector<128x256xi32> to vector<128x256xf32>
    %cst_10 = arith.constant dense<0.000000e+00> : vector<256xf32>
    %41 = vector.multi_reduction <add>, %40, %cst_10 [0] : vector<128x256xf32> to vector<256xf32>
    %42 = vector.shape_cast %41 : vector<256xf32> to vector<1x256xf32>
    %43 = arith.addf %25, %42 : vector<1x256xf32>
    %44 = vector.shape_cast %43 : vector<1x256xf32> to vector<1x1x256xf32>
    %c0_11 = arith.constant 0 : index
    %c0_12 = arith.constant 0 : index
    %c0_13 = arith.constant 0 : index
    %45 = vector.load %arg4[%c0_11, %c0_12, %c0_13] : memref<1x2x256xf32, #tpu.memory_space<vmem>>, vector<1x1x256xf32>
    tpu.vector_store %arg4[%c0_11, %c0_12, %c0_13], %44 {strides = array<i32>} : memref<1x2x256xf32, #tpu.memory_space<vmem>>, vector<1x1x256xf32>,
    %c0_14 = arith.constant 0 : index
    %c1_15 = arith.constant 1 : index
    %c0_16 = arith.constant 0 : index
    %c0_17 = arith.constant 0 : index
    %46 = vector.load %arg2[%c0_14, %c1_15, %c0_16, %c0_17] : memref<1x2x128x1xf32, #tpu.memory_space<vmem>>, vector<1x1x128x1xf32>
    %47 = vector.shape_cast %46 : vector<1x1x128x1xf32> to vector<128x1xf32>
    %c0_18 = arith.constant 0 : index
    %c1_19 = arith.constant 1 : index
    %c0_20 = arith.constant 0 : index
    %c0_21 = arith.constant 0 : index
    %48 = vector.load %arg3[%c0_18, %c1_19, %c0_20, %c0_21] : memref<1x2x128x1xf32, #tpu.memory_space<vmem>>, vector<1x1x128x1xf32>
    %49 = vector.shape_cast %48 : vector<1x1x128x1xf32> to vector<128x1xf32>
    %50 = vector.broadcast %0 : f32 to vector<128x1xf32>
    %51 = arith.subf %47, %50 : vector<128x1xf32>
    %52 = vector.broadcast %1 : f32 to vector<128x1xf32>
    %53 = arith.mulf %51, %52 : vector<128x1xf32>
    %54 = math.floor %53 : vector<128x1xf32>
    %55 = arith.fptosi %54 : vector<128x1xf32> to vector<128x1xi32>
    %c0_i32_22 = arith.constant 0 : i32
    %c255_i32_23 = arith.constant 255 : i32
    %56 = vector.broadcast %c0_i32_22 : i32 to vector<128x1xi32>
    %57 = arith.maxsi %56, %55 : vector<128x1xi32>
    %58 = vector.broadcast %c255_i32_23 : i32 to vector<128x1xi32>
    %59 = arith.minsi %58, %57 : vector<128x1xi32>
    %60 = vector.broadcast %59 : vector<128x1xi32> to vector<128x256xi32>
    %61 = vector.broadcast %4 : vector<1x256xi32> to vector<128x256xi32>
    %62 = arith.cmpi eq, %60, %61 : vector<128x256xi32>
    %63 = arith.extui %62 : vector<128x256xi1> to vector<128x256xi32>
    %64 = arith.sitofp %63 : vector<128x256xi32> to vector<128x256xf32>
    %cst_24 = arith.constant dense<0.000000e+00> : vector<256xf32>
    %65 = vector.multi_reduction <add>, %64, %cst_24 [0] : vector<128x256xf32> to vector<256xf32>
    %66 = vector.shape_cast %65 : vector<256xf32> to vector<1x256xf32>
    %67 = vector.broadcast %2 : f32 to vector<128x1xf32>
    %68 = arith.subf %49, %67 : vector<128x1xf32>
    %69 = vector.broadcast %3 : f32 to vector<128x1xf32>
    %70 = arith.mulf %68, %69 : vector<128x1xf32>
    %71 = math.floor %70 : vector<128x1xf32>
    %72 = arith.fptosi %71 : vector<128x1xf32> to vector<128x1xi32>
    %c0_i32_25 = arith.constant 0 : i32
    %c255_i32_26 = arith.constant 255 : i32
    %73 = vector.broadcast %c0_i32_25 : i32 to vector<128x1xi32>
    %74 = arith.maxsi %73, %72 : vector<128x1xi32>
    %75 = vector.broadcast %c255_i32_26 : i32 to vector<128x1xi32>
    %76 = arith.minsi %75, %74 : vector<128x1xi32>
    %77 = vector.broadcast %76 : vector<128x1xi32> to vector<128x256xi32>
    %78 = vector.broadcast %4 : vector<1x256xi32> to vector<128x256xi32>
    %79 = arith.cmpi eq, %77, %78 : vector<128x256xi32>
    %80 = arith.extui %79 : vector<128x256xi1> to vector<128x256xi32>
    %81 = arith.sitofp %80 : vector<128x256xi32> to vector<128x256xf32>
    %cst_27 = arith.constant dense<0.000000e+00> : vector<256xf32>
    %82 = vector.multi_reduction <add>, %81, %cst_27 [0] : vector<128x256xf32> to vector<256xf32>
    %83 = vector.shape_cast %82 : vector<256xf32> to vector<1x256xf32>
    %84 = arith.addf %66, %83 : vector<1x256xf32>
    %85 = vector.shape_cast %84 : vector<1x256xf32> to vector<1x1x256xf32>
    %c0_28 = arith.constant 0 : index
    %c1_29 = arith.constant 1 : index
    %c0_30 = arith.constant 0 : index
    %86 = vector.load %arg4[%c0_28, %c1_29, %c0_30] : memref<1x2x256xf32, #tpu.memory_space<vmem>>, vector<1x1x256xf32>
    tpu.vector_store %arg4[%c0_28, %c1_29, %c0_30], %85 {strides = array<i32>} : memref<1x2x256xf32, #tpu.memory_space<vmem>>, vector<1x1x256xf32>,
    return
  }
  func.func @transform_0(%arg0: i32) -> i32 {
    %c0_i32 = arith.constant 0 : i32
    %c0_i32_0 = arith.constant 0 : i32
    return %c0_i32 : i32
  }
  func.func @transform_1(%arg0: i32) -> (i32, i32, i32, i32) {
    %c0_i32 = arith.constant 0 : i32
    %c0_i32_0 = arith.constant 0 : i32
    %c0_i32_1 = arith.constant 0 : i32
    %c0_i32_2 = arith.constant 0 : i32
    return %arg0, %c0_i32, %c0_i32_0, %c0_i32_1 : i32, i32, i32, i32
  }
  func.func @transform_2(%arg0: i32) -> (i32, i32, i32, i32) {
    %c0_i32 = arith.constant 0 : i32
    %c0_i32_0 = arith.constant 0 : i32
    %c0_i32_1 = arith.constant 0 : i32
    %c0_i32_2 = arith.constant 0 : i32
    return %arg0, %c0_i32, %c0_i32_0, %c0_i32_1 : i32, i32, i32, i32
  }
  func.func @transform_3(%arg0: i32) -> (i32, i32, i32) {
    %c0_i32 = arith.constant 0 : i32
    %c0_i32_0 = arith.constant 0 : i32
    %c0_i32_1 = arith.constant 0 : i32
    return %arg0, %c0_i32, %c0_i32_0 : i32, i32, i32
  }
}

</mosaic_0001>

<bundles_post_ra>
// kernel: _lambda_.1
= control target key start
LH: loop header
LB: loop body
LE: loop exit
PB: predicated region body
PF: predicated region fallthrough
CT: control target
= control target key end

     0   :  { %8 = vsyncpa [#allocation3], 0  ;;  %s2049_s12 = smov 0   ;;  %s2652_s0 = inlined_call_operand.vmem [shape: f32[4], index: 0, kind: input, shape index: {}]   ;;  %s2653_s1 = inlined_call_operand.vmem [shape: f32[2,2,128,1], index: 1, kind: input, shape index: {}]   ;;  %s2654_s2 = inlined_call_operand.vmem [shape: f32[2,2,128,1], index: 2, kind: input, shape index: {}]   ;;  %s2655_s3 = inlined_call_operand.vmem [shape: f32[2,2,256], index: 3, kind: output, shape index: {}]  }
   0x1 LB: > { %s2055_s13 = sadd.s32 4294967295, %s2023_s12   ;;  %p1666_p0 = scmp.ge.s32.totalorder %s2023_s12, 1  ;;  %s2023_s12 = sphi %s2049_s12, %s14_s12  }
   0x2   : > { %p118_p1 = scmp.lt.s32.totalorder %s2023_s12, 3  ;;  %s131_s16 = sshll.u32 %s2652_s0, 4  ;;  %s132_s16 = int_to_ptr.vmem [resolvable:$true] %s131_s16 }
   0x3   : > { %p1982_p3 = scmp.eq.s32.totalorder %s2055_s13, 0  ;;  %s1998_s18 = scalar_lea.vmem %s132_s16, 16 }
   0x4   : > { %p2062_p2 = pnand %p1666_p0, %p118_p1  ;;  %p1999_p6 = scmp.ne.s32.totalorder %s132_s16, %s1998_s18 }
   0x5   : > { %p2006_p10 = scmp.lt.s32.totalorder %s132_s16, %s132_s16  ;;  %p2007_p11 = scmp.lt.s32.totalorder %s1998_s18, %s1998_s18 }
   0x6   : > { %p1978_p4 = pneg %p2062_p2 }
   0x7   : > { %p2008_p12 = por %p2007_p11, %p2006_p10 }
   0x8   : > { %p1979_p5 = pnand %p1982_p3, %p1978_p4 }
   0xa   : > { %p2000_p7 = pneg %p1979_p5 }
   0xc   : > { %p2001_p8 = pnand %p2000_p7, %p1999_p6 }
   0xe   : > { %p2002_p9 = pneg %p2001_p8 }
  0x10   : > { %p2009_p13 = pnand %p2008_p12, %p2002_p9 }
  0x12   : > { %2012 = shalt.err (!%p2009_p13)
}
  0x13   : > { %s2025_s19 = smov [#allocation2]   ;;  %160 = sbr.rel (%p2062_p2) target bundleno = 340 (0x154), region = 32 }
  0x14   : > { %1981 = dma.vmem_to_smem (!%p1979_p5), %s132_s16, 16, %s2025_s19, [#allocation3]  }
  0x1a   : > { %2018 = dma.done.wait (%p1982_p3), [#allocation3], 16  }
  0x1b   : > { %2020 = vsyncadd (%p1982_p3), [#allocation3], 4294967280 }
  0x1c   : > { %166 = sfence }
  0x1d   : > { %p190_p0 = scmp.lt.s32.totalorder %s2055_s13, 1  ;;  %s205_s20 = sld [smem:[#allocation2]]  ;;  %v2026_v0 = vmov 0  }
  0x1e   : > { %1997 = vset.pattern.permute.xlu1 %v2026_v0  ;;  %1996 = vset.pattern.permute.xlu0 %v2026_v0  ;;  %s1677_s21 = sld [smem:[#allocation2 + $0x1]]  ;;  %s1678_s22 = sld [smem:[#allocation2 + $0x2]] }
  0x1f   : > { %s2660_s13 = smov (!%p190_p0, %s2055_s13), 1  ;;  %s2143_s27 = sld [smem:[#allocation2 + $0x3]] }
  0x20   : > { %s1843_s23 = sshll.u32 %s2660_s13, 8  ;;  %s1845_s4 = sshll.u32 %s2660_s13, 2 }
  0x21   : > { %s2087_s26 = scalar_lea.vmem %s2653_s1, %s1843_s23  ;;  %s2150_s30 = scalar_lea.vmem %s2654_s2, %s1843_s23 }
  0x22   : > { %v214_v1 = vld [vmem:[%s2087_s26 + $0x10] sm:$0xff]  ;;  %v212_v3 = vld [vmem:[%s2087_s26] sm:$0xff]  ;;  %v215_v4 = vld [vmem:[%s2087_s26 + $0x18] sm:$0xff]  ;;  %s2492_s7 = scalar_lea.vmem %s2655_s3, %s1845_s4 }
  0x23   : > { %v2090_v2 = vstv %s205_s20  ;;  %v213_v9 = vld [vmem:[%s2087_s26 + $0x8] sm:$0xff]  ;;  %v216_v11 = vld [vmem:[%s2087_s26 + $0x20] sm:$0xff]  ;;  %v219_v15 = vld [vmem:[%s2087_s26 + $0x38] sm:$0xff] }
  0x24   : > { %v247_v5 = vsub.f32 %v214_v1, %v2090_v2  ;;  %v2095_v6 = vstv %s1677_s21  ;;  %v245_v7 = vsub.f32 %v212_v3, %v2090_v2  ;;  %v248_v8 = vsub.f32 %v215_v4, %v2090_v2  ;;  %v217_v10 = vld [vmem:[%s2087_s26 + $0x28] sm:$0xff]  ;;  %v218_v16 = vld [vmem:[%s2087_s26 + $0x30] sm:$0xff]  ;;  %v220_v0 = vld [vmem:[%s2087_s26 + $0x40] sm:$0xff] }
  0x25   : > { %v246_v12 = vsub.f32 %v213_v9, %v2090_v2  ;;  %v250_v13 = vsub.f32 %v217_v10, %v2090_v2  ;;  %v249_v14 = vsub.f32 %v216_v11, %v2090_v2  ;;  %v2107_v17 = vstv %s1678_s22  ;;  %v221_v58 = vld [vmem:[%s2087_s26 + $0x48] sm:$0xff]  ;;  %v223_v1 = vld [vmem:[%s2087_s26 + $0x58] sm:$0xff]  ;;  %v222_v4 = vld [vmem:[%s2087_s26 + $0x50] sm:$0xff] }
  0x26   : > { %v264_v18 = vmul.f32 %v2095_v6, %v247_v5  ;;  %v262_v19 = vmul.f32 %v2095_v6, %v245_v7  ;;  %v265_v20 = vmul.f32 %v2095_v6, %v248_v8  ;;  %v252_v21 = vsub.f32 %v219_v15, %v2090_v2  ;;  %v225_v5 = vld [vmem:[%s2087_s26 + $0x68] sm:$0xff]  ;;  %v224_v7 = vld [vmem:[%s2087_s26 + $0x60] sm:$0xff]  ;;  %v227_v15 = vld [vmem:[%s2087_s26 + $0x78] sm:$0xff] }
  0x27   : > { %v263_v22 = vmul.f32 %v2095_v6, %v246_v12  ;;  %v267_v23 = vmul.f32 %v2095_v6, %v250_v13  ;;  %v266_v24 = vmul.f32 %v2095_v6, %v249_v14  ;;  %v251_v25 = vsub.f32 %v218_v16, %v2090_v2 }
  0x28   : > { %v280_v26 = vfloor.f32 %v264_v18  ;;  %v278_v27 = vfloor.f32 %v262_v19  ;;  %v281_v28 = vfloor.f32 %v265_v20  ;;  %v269_v29 = vmul.f32 %v2095_v6, %v252_v21  ;;  %v226_v20 = vld [vmem:[%s2087_s26 + $0x70] sm:$0xff] }
  0x29   : > { %v279_v30 = vfloor.f32 %v263_v22  ;;  %v283_v31 = vfloor.f32 %v267_v23  ;;  %v282_v32 = vfloor.f32 %v266_v24  ;;  %v268_v33 = vmul.f32 %v2095_v6, %v251_v25 }
  0x2a   : > { %v1850_v34 = vtrunc.f32 %v280_v26  ;;  %v1846_v35 = vtrunc.f32 %v278_v27  ;;  %v1852_v36 = vtrunc.f32 %v281_v28  ;;  %v285_v37 = vfloor.f32 %v269_v29 }
  0x2b   : > { %v1848_v38 = vtrunc.f32 %v279_v30  ;;  %v1856_v39 = vtrunc.f32 %v283_v31  ;;  %v1854_v40 = vtrunc.f32 %v282_v32  ;;  %v284_v41 = vfloor.f32 %v268_v33 }
  0x2c   : > { %v1851_v42 = vcvt.f32.s32 %v1850_v34  ;;  %v1847_v43 = vcvt.f32.s32 %v1846_v35  ;;  %v1853_v44 = vcvt.f32.s32 %v1852_v36  ;;  %v1860_v45 = vtrunc.f32 %v285_v37 }
  0x2d   : > { %v1849_v46 = vcvt.f32.s32 %v1848_v38  ;;  %v1857_v47 = vcvt.f32.s32 %v1856_v39  ;;  %v1855_v48 = vcvt.f32.s32 %v1854_v40  ;;  %v1858_v49 = vtrunc.f32 %v284_v41 }
  0x2e   : > { %vm314_vm0 = vcmp.gt.s32.totalorder %v1851_v42, 0  ;;  %vm310_vm1 = vcmp.gt.s32.totalorder %v1847_v43, 0  ;;  %vm316_vm2 = vcmp.gt.s32.totalorder %v1853_v44, 0  ;;  %v1861_v50 = vcvt.f32.s32 %v1860_v45 }
  0x2f   : > { %v315_v51 = vsel %vm314_vm0, %v1851_v42, 0  ;;  %v311_v52 = vsel %vm310_vm1, %v1847_v43, 0  ;;  %v317_v53 = vsel %vm316_vm2, %v1853_v44, 0  ;;  %vm312_vm3 = vcmp.gt.s32.totalorder %v1849_v46, 0 }
  0x30   : > { %vm346_vm4 = vcmp.lt.s32.totalorder %v315_v51, 255  ;;  %vm342_vm5 = vcmp.lt.s32.totalorder %v311_v52, 255  ;;  %vm348_vm6 = vcmp.lt.s32.totalorder %v317_v53, 255  ;;  %v313_v54 = vsel %vm312_vm3, %v1849_v46, 0 }
  0x31   : > { %v347_v55 = vsel %vm346_vm4, %v315_v51, 255  ;;  %v343_v56 = vsel %vm342_vm5, %v311_v52, 255  ;;  %v349_v57 = vsel %vm348_vm6, %v317_v53, 255  ;;  %vm344_vm7 = vcmp.lt.s32.totalorder %v313_v54, 255 }
  0x32   : > { %381 = vperm.xlu1 %1997, %v347_v55   ;;  %375 = vperm.xlu0 %1996, %v343_v56   ;;  %v345_v59 = vsel %vm344_vm7, %v313_v54, 255  ;;  %vm320_vm8 = vcmp.gt.s32.totalorder %v1857_v47, 0  ;;  %vm318_vm9 = vcmp.gt.s32.totalorder %v1855_v48, 0  ;;  %vm324_vm10 = vcmp.gt.s32.totalorder %v1861_v50, 0 }
  0x33   : > { %v321_v60 = vsel %vm320_vm8, %v1857_v47, 0  ;;  %v319_v61 = vsel %vm318_vm9, %v1855_v48, 0  ;;  %v325_v62 = vsel %vm324_vm10, %v1861_v50, 0  ;;  %v1859_v63 = vcvt.f32.s32 %v1858_v49 }
  0x34   : > { %vm352_vm11 = vcmp.lt.s32.totalorder %v321_v60, 255  ;;  %vm350_vm12 = vcmp.lt.s32.totalorder %v319_v61, 255  ;;  %vm356_vm13 = vcmp.lt.s32.totalorder %v325_v62, 255  ;;  %v254_v3 = vsub.f32 %v221_v58, %v2090_v2 }
  0x35   : > { %v353_v8 = vsel %vm352_vm11, %v321_v60, 255  ;;  %v351_v9 = vsel %vm350_vm12, %v319_v61, 255  ;;  %v357_v10 = vsel %vm356_vm13, %v325_v62, 255  ;;  %vm322_vm14 = vcmp.gt.s32.totalorder %v1859_v63, 0  ;;  %v228_v61 = vld [vmem:[%s2150_s30] sm:$0xff] }
  0x36   : > { %384 = vperm.xlu1 %1997, %v349_v57   ;;  %378 = vperm.xlu0 %1996, %v345_v59   ;;  %v323_v11 = vsel %vm322_vm14, %v1859_v63, 0  ;;  %v271_v12 = vmul.f32 %v2095_v6, %v254_v3  ;;  %v253_v13 = vsub.f32 %v220_v0, %v2090_v2  ;;  %v256_v14 = vsub.f32 %v223_v1, %v2090_v2  ;;  %v229_v57 = vld [vmem:[%s2150_s30 + $0x8] sm:$0xff] }
  0x37   : > { %vm354_vm15 = vcmp.lt.s32.totalorder %v323_v11, 255  ;;  %v255_v16 = vsub.f32 %v222_v4, %v2090_v2  ;;  %v258_v18 = vsub.f32 %v225_v5, %v2090_v2  ;;  %v257_v19 = vsub.f32 %v224_v7, %v2090_v2  ;;  %v231_v5 = vld [vmem:[%s2150_s30 + $0x18] sm:$0xff]  ;;  %v230_v7 = vld [vmem:[%s2150_s30 + $0x10] sm:$0xff] }
  0x38   : > { %v355_v21 = vsel %vm354_vm15, %v323_v11, 255  ;;  %v287_v22 = vfloor.f32 %v271_v12  ;;  %v270_v23 = vmul.f32 %v2095_v6, %v253_v13  ;;  %v273_v24 = vmul.f32 %v2095_v6, %v256_v14 }
  0x39   : > { %v272_v25 = vmul.f32 %v2095_v6, %v255_v16  ;;  %v275_v26 = vmul.f32 %v2095_v6, %v258_v18  ;;  %v274_v27 = vmul.f32 %v2095_v6, %v257_v19  ;;  %v260_v28 = vsub.f32 %v227_v15, %v2090_v2  ;;  %v232_v19 = vld [vmem:[%s2150_s30 + $0x20] sm:$0xff] }
  0x3a   : > { %390 = vperm.xlu1 %1997, %v353_v8   ;;  %387 = vperm.xlu0 %1996, %v351_v9   ;;  %v1864_v29 = vtrunc.f32 %v287_v22  ;;  %v286_v30 = vfloor.f32 %v270_v23  ;;  %v289_v31 = vfloor.f32 %v273_v24  ;;  %v259_v32 = vsub.f32 %v226_v20, %v2090_v2 }
  0x3b   : > { %v288_v33 = vfloor.f32 %v272_v25  ;;  %v291_v34 = vfloor.f32 %v275_v26  ;;  %v290_v35 = vfloor.f32 %v274_v27  ;;  %v277_v36 = vmul.f32 %v2095_v6, %v260_v28  ;;  %v235_v27 = vld [vmem:[%s2150_s30 + $0x38] sm:$0xff] }
  0x3c   : > { %v1865_v37 = vcvt.f32.s32 %v1864_v29  ;;  %v1862_v38 = vtrunc.f32 %v286_v30  ;;  %v1868_v39 = vtrunc.f32 %v289_v31  ;;  %v276_v40 = vmul.f32 %v2095_v6, %v259_v32  ;;  %v234_v31 = vld [vmem:[%s2150_s30 + $0x30] sm:$0xff] }
  0x3d   : > { %v1866_v41 = vtrunc.f32 %v288_v33  ;;  %v1872_v42 = vtrunc.f32 %v291_v34  ;;  %v1870_v43 = vtrunc.f32 %v290_v35  ;;  %v293_v44 = vfloor.f32 %v277_v36 }
  0x3e   : > { %396 = vperm.xlu1 %1997, %v357_v10   ;;  %393 = vperm.xlu0 %1996, %v355_v21   ;;  %vm328_vm0 = vcmp.gt.s32.totalorder %v1865_v37, 0  ;;  %v1863_v45 = vcvt.f32.s32 %v1862_v38  ;;  %v1869_v46 = vcvt.f32.s32 %v1868_v39  ;;  %v292_v47 = vfloor.f32 %v276_v40  ;;  %v233_v10 = vld [vmem:[%s2150_s30 + $0x28] sm:$0xff] }
  0x3f   : > { %v329_v48 = vsel %vm328_vm0, %v1865_v37, 0  ;;  %v1867_v49 = vcvt.f32.s32 %v1866_v41  ;;  %v1873_v50 = vcvt.f32.s32 %v1872_v42  ;;  %v1871_v51 = vcvt.f32.s32 %v1870_v43 }
  0x40   : > { %vm360_vm1 = vcmp.lt.s32.totalorder %v329_v48, 255  ;;  %vm326_vm2 = vcmp.gt.s32.totalorder %v1863_v45, 0  ;;  %vm332_vm3 = vcmp.gt.s32.totalorder %v1869_v46, 0  ;;  %v1876_v52 = vtrunc.f32 %v293_v44 }
  0x41   : > { %v361_v53 = vsel %vm360_vm1, %v329_v48, 255  ;;  %v327_v54 = vsel %vm326_vm2, %v1863_v45, 0  ;;  %v333_v55 = vsel %vm332_vm3, %v1869_v46, 0  ;;  %vm330_vm4 = vcmp.gt.s32.totalorder %v1867_v49, 0 }
  0x42   : > { %402 = vperm.xlu1 %1997, %v361_v53   ;;  %vm358_vm5 = vcmp.lt.s32.totalorder %v327_v54, 255  ;;  %vm364_vm6 = vcmp.lt.s32.totalorder %v333_v55, 255  ;;  %v331_v56 = vsel %vm330_vm4, %v1867_v49, 0  ;;  %vm336_vm7 = vcmp.gt.s32.totalorder %v1873_v50, 0 }
  0x43   : > { %v359_v58 = vsel %vm358_vm5, %v327_v54, 255  ;;  %v365_v59 = vsel %vm364_vm6, %v333_v55, 255  ;;  %vm362_vm8 = vcmp.lt.s32.totalorder %v331_v56, 255  ;;  %v337_v60 = vsel %vm336_vm7, %v1873_v50, 0 }
  0x44   : > { %399 = vperm.xlu0 %1996, %v359_v58   ;;  %v363_v62 = vsel %vm362_vm8, %v331_v56, 255  ;;  %vm368_vm9 = vcmp.lt.s32.totalorder %v337_v60, 255  ;;  %vm334_vm10 = vcmp.gt.s32.totalorder %v1871_v51, 0  ;;  %v1877_v63 = vcvt.f32.s32 %v1876_v52 }
  0x45   : > { %v369_v0 = vsel %vm368_vm9, %v337_v60, 255  ;;  %v335_v1 = vsel %vm334_vm10, %v1871_v51, 0  ;;  %v1874_v3 = vtrunc.f32 %v292_v47  ;;  %v562_v4 = vsub.f32 %v229_v57, %v2107_v17  ;;  %v237_v57 = vld [vmem:[%s2150_s30 + $0x48] sm:$0xff]  ;;  %v236_v60 = vld [vmem:[%s2150_s30 + $0x40] sm:$0xff] }
  0x46   : > { %408 = vperm.xlu1 %1997, %v365_v59   ;;  %vm366_vm11 = vcmp.lt.s32.totalorder %v335_v1, 255  ;;  %vm340_vm12 = vcmp.gt.s32.totalorder %v1877_v63, 0  ;;  %v2158_v8 = vstv %s2143_s27  ;;  %v561_v9 = vsub.f32 %v228_v61, %v2107_v17  ;;  %v239_v61 = vld [vmem:[%s2150_s30 + $0x58] sm:$0xff] }
  0x47   : > { %v367_v11 = vsel %vm366_vm11, %v335_v1, 255  ;;  %v341_v12 = vsel %vm340_vm12, %v1877_v63, 0  ;;  %v1875_v13 = vcvt.f32.s32 %v1874_v3  ;;  %v579_v14 = vmul.f32 %v2158_v8, %v562_v4  ;;  %v238_v1 = vld [vmem:[%s2150_s30 + $0x50] sm:$0xff] }
  0x48   : > { %405 = vperm.xlu0 %1996, %v363_v62   ;;  %vm372_vm13 = vcmp.lt.s32.totalorder %v341_v12, 255  ;;  %v578_v15 = vmul.f32 %v2158_v8, %v561_v9  ;;  %v564_v16 = vsub.f32 %v231_v5, %v2107_v17  ;;  %v563_v18 = vsub.f32 %v230_v7, %v2107_v17 }
  0x49   : > { %v373_v20 = vsel %vm372_vm13, %v341_v12, 255  ;;  %vm338_vm14 = vcmp.gt.s32.totalorder %v1875_v13, 0  ;;  %v595_v21 = vfloor.f32 %v579_v14  ;;  %v566_v22 = vsub.f32 %v233_v10, %v2107_v17  ;;  %v241_v12 = vld [vmem:[%s2150_s30 + $0x68] sm:$0xff] }
  0x4a   : > { %414 = vperm.xlu1 %1997, %v369_v0   ;;  %v339_v23 = vsel %vm338_vm14, %v1875_v13, 0  ;;  %v594_v24 = vfloor.f32 %v578_v15  ;;  %v581_v25 = vmul.f32 %v2158_v8, %v564_v16  ;;  %v580_v26 = vmul.f32 %v2158_v8, %v563_v18  ;;  %v240_v16 = vld [vmem:[%s2150_s30 + $0x60] sm:$0xff] }
  0x4b   : > { %vm370_vm15 = vcmp.lt.s32.totalorder %v339_v23, 255  ;;  %v1880_v28 = vtrunc.f32 %v595_v21  ;;  %v583_v29 = vmul.f32 %v2158_v8, %v566_v22  ;;  %v565_v30 = vsub.f32 %v232_v19, %v2107_v17 }
  0x4c   : > { %411 = vperm.xlu0 %1996, %v367_v11   ;;  %v371_v32 = vsel %vm370_vm15, %v339_v23, 255  ;;  %v1878_v33 = vtrunc.f32 %v594_v24  ;;  %v597_v34 = vfloor.f32 %v581_v25  ;;  %v596_v35 = vfloor.f32 %v580_v26 }
  0x4d   : > { %v1881_v36 = vcvt.f32.s32 %v1880_v28  ;;  %v599_v37 = vfloor.f32 %v583_v29  ;;  %v582_v38 = vmul.f32 %v2158_v8, %v565_v30  ;;  %v568_v39 = vsub.f32 %v235_v27, %v2107_v17 }
  0x4e   : > { %420 = vperm.xlu1 %1997, %v373_v20   ;;  %v1879_v40 = vcvt.f32.s32 %v1878_v33  ;;  %v1884_v41 = vtrunc.f32 %v597_v34  ;;  %v1882_v42 = vtrunc.f32 %v596_v35  ;;  %v567_v43 = vsub.f32 %v234_v31, %v2107_v17 }
  0x4f   : > { %vm628_vm0 = vcmp.gt.s32.totalorder %v1881_v36, 0  ;;  %v1888_v44 = vtrunc.f32 %v599_v37  ;;  %v598_v45 = vfloor.f32 %v582_v38  ;;  %v585_v46 = vmul.f32 %v2158_v8, %v568_v39 }
  0x50   : > { %417 = vperm.xlu0 %1996, %v371_v32   ;;  %v629_v47 = vsel %vm628_vm0, %v1881_v36, 0  ;;  %vm626_vm1 = vcmp.gt.s32.totalorder %v1879_v40, 0  ;;  %v1885_v48 = vcvt.f32.s32 %v1884_v41  ;;  %v1883_v49 = vcvt.f32.s32 %v1882_v42 }
  0x51   : > { %vm660_vm2 = vcmp.lt.s32.totalorder %v629_v47, 255  ;;  %v627_v50 = vsel %vm626_vm1, %v1879_v40, 0  ;;  %v1889_v51 = vcvt.f32.s32 %v1888_v44  ;;  %v1886_v52 = vtrunc.f32 %v598_v45 }
  0x52   : > { %v661_v53 = vsel %vm660_vm2, %v629_v47, 255  ;;  %vm658_vm3 = vcmp.lt.s32.totalorder %v627_v50, 255  ;;  %vm632_vm4 = vcmp.gt.s32.totalorder %v1885_v48, 0  ;;  %vm630_vm5 = vcmp.gt.s32.totalorder %v1883_v49, 0  ;;  %v243_v47 = vld [vmem:[%s2150_s30 + $0x78] sm:$0xff] }
  0x53   : > { %694 = vperm.xlu1 %1997, %v661_v53   ;;  %v659_v54 = vsel %vm658_vm3, %v627_v50, 255  ;;  %v633_v55 = vsel %vm632_vm4, %v1885_v48, 0  ;;  %v631_v56 = vsel %vm630_vm5, %v1883_v49, 0  ;;  %vm636_vm6 = vcmp.gt.s32.totalorder %v1889_v51, 0  ;;  %v242_v50 = vld [vmem:[%s2150_s30 + $0x70] sm:$0xff] }
  0x54   : > { %691 = vperm.xlu0 %1996, %v659_v54   ;;  %vm664_vm7 = vcmp.lt.s32.totalorder %v633_v55, 255  ;;  %vm662_vm8 = vcmp.lt.s32.totalorder %v631_v56, 255  ;;  %v637_v58 = vsel %vm636_vm6, %v1889_v51, 0  ;;  %v1887_v59 = vcvt.f32.s32 %v1886_v52  ;;  %v1745_v51 = vld [vmem:[%s2087_s26 + $0x88] sm:$0xff]  ;;  %v1744_v54 = vld [vmem:[%s2087_s26 + $0x80] sm:$0xff] }
  0x55   : > { %v665_v62 = vsel %vm664_vm7, %v633_v55, 255  ;;  %v663_v63 = vsel %vm662_vm8, %v631_v56, 255  ;;  %vm668_vm9 = vcmp.lt.s32.totalorder %v637_v58, 255  ;;  %v601_v0 = vfloor.f32 %v585_v46  ;;  %v1760_v55 = vld [vmem:[%s2150_s30 + $0x80] sm:$0xff] }
  0x56   : > { %v669_v3 = vsel %vm668_vm9, %v637_v58, 255  ;;  %vm634_vm10 = vcmp.gt.s32.totalorder %v1887_v59, 0  ;;  %v584_v4 = vmul.f32 %v2158_v8, %v567_v43  ;;  %v570_v5 = vsub.f32 %v237_v57, %v2107_v17 }
  0x57   : > { %700 = vperm.xlu1 %1997, %v665_v62   ;;  %v635_v7 = vsel %vm634_vm10, %v1887_v59, 0  ;;  %v1892_v9 = vtrunc.f32 %v601_v0  ;;  %v569_v10 = vsub.f32 %v236_v60, %v2107_v17  ;;  %v572_v11 = vsub.f32 %v239_v61, %v2107_v17  ;;  %v1746_v59 = vld [vmem:[%s2087_s26 + $0x90] sm:$0xff] }
  0x58   : > { %697 = vperm.xlu0 %1996, %v663_v63   ;;  %vm666_vm11 = vcmp.lt.s32.totalorder %v635_v7, 255  ;;  %v600_v13 = vfloor.f32 %v584_v4  ;;  %v587_v14 = vmul.f32 %v2158_v8, %v570_v5  ;;  %v571_v15 = vsub.f32 %v238_v1, %v2107_v17 }
  0x59   : > { %v667_v18 = vsel %vm666_vm11, %v635_v7, 255  ;;  %v1893_v19 = vcvt.f32.s32 %v1892_v9  ;;  %v586_v20 = vmul.f32 %v2158_v8, %v569_v10  ;;  %v589_v21 = vmul.f32 %v2158_v8, %v572_v11 }
  0x5a   : > { %v1890_v22 = vtrunc.f32 %v600_v13  ;;  %v603_v23 = vfloor.f32 %v587_v14  ;;  %v588_v24 = vmul.f32 %v2158_v8, %v571_v15  ;;  %v574_v25 = vsub.f32 %v241_v12, %v2107_v17 }
  0x5b   : > { %706 = vperm.xlu1 %1997, %v669_v3   ;;  %vm640_vm12 = vcmp.gt.s32.totalorder %v1893_v19, 0  ;;  %v602_v26 = vfloor.f32 %v586_v20  ;;  %v605_v27 = vfloor.f32 %v589_v21  ;;  %v573_v28 = vsub.f32 %v240_v16, %v2107_v17 }
  0x5c   : > { %703 = vperm.xlu0 %1996, %v667_v18   ;;  %v641_v29 = vsel %vm640_vm12, %v1893_v19, 0  ;;  %v1891_v30 = vcvt.f32.s32 %v1890_v22  ;;  %v1896_v31 = vtrunc.f32 %v603_v23  ;;  %v604_v32 = vfloor.f32 %v588_v24 }
  0x5d   : > { %vm672_vm13 = vcmp.lt.s32.totalorder %v641_v29, 255  ;;  %v1894_v33 = vtrunc.f32 %v602_v26  ;;  %v1900_v34 = vtrunc.f32 %v605_v27  ;;  %v591_v35 = vmul.f32 %v2158_v8, %v574_v25 }
  0x5e   : > { %v673_v36 = vsel %vm672_vm13, %v641_v29, 255  ;;  %vm638_vm14 = vcmp.gt.s32.totalorder %v1891_v30, 0  ;;  %v1897_v37 = vcvt.f32.s32 %v1896_v31  ;;  %v1898_v38 = vtrunc.f32 %v604_v32  ;;  %v1762_v29 = vld [vmem:[%s2150_s30 + $0x90] sm:$0xff] }
  0x5f   : > { %712 = vperm.xlu1 %1997, %v673_v36   ;;  %v639_v39 = vsel %vm638_vm14, %v1891_v30, 0  ;;  %v1895_v40 = vcvt.f32.s32 %v1894_v33  ;;  %v1901_v41 = vcvt.f32.s32 %v1900_v34  ;;  %v607_v42 = vfloor.f32 %v591_v35 }
  0x60   : > { %vm670_vm15 = vcmp.lt.s32.totalorder %v639_v39, 255  ;;  %vm644_vm0 = vcmp.gt.s32.totalorder %v1897_v37, 0  ;;  %v1899_v43 = vcvt.f32.s32 %v1898_v38  ;;  %v590_v44 = vmul.f32 %v2158_v8, %v573_v28 }
  0x61   : > { %v671_v45 = vsel %vm670_vm15, %v639_v39, 255  ;;  %v645_v46 = vsel %vm644_vm0, %v1897_v37, 0  ;;  %vm642_vm1 = vcmp.gt.s32.totalorder %v1895_v40, 0  ;;  %vm648_vm2 = vcmp.gt.s32.totalorder %v1901_v41, 0 }
  0x62   : > { %709 = vperm.xlu0 %1996, %v671_v45   ;;  %vm676_vm3 = vcmp.lt.s32.totalorder %v645_v46, 255  ;;  %v643_v48 = vsel %vm642_vm1, %v1895_v40, 0  ;;  %v649_v49 = vsel %vm648_vm2, %v1901_v41, 0  ;;  %vm646_vm4 = vcmp.gt.s32.totalorder %v1899_v43, 0 }
  0x63   : > { %v677_v52 = vsel %vm676_vm3, %v645_v46, 255  ;;  %vm674_vm5 = vcmp.lt.s32.totalorder %v643_v48, 255  ;;  %vm680_vm6 = vcmp.lt.s32.totalorder %v649_v49, 255  ;;  %v647_v53 = vsel %vm646_vm4, %v1899_v43, 0  ;;  %v1761_v43 = vld [vmem:[%s2150_s30 + $0x88] sm:$0xff] }
  0x64   : > { %718 = vperm.xlu1 %1997, %v677_v52   ;;  %v675_v56 = vsel %vm674_vm5, %v643_v48, 255  ;;  %v681_v57 = vsel %vm680_vm6, %v649_v49, 255  ;;  %vm678_vm7 = vcmp.lt.s32.totalorder %v647_v53, 255  ;;  %v1904_v58 = vtrunc.f32 %v607_v42  ;;  %v1764_v48 = vld [vmem:[%s2150_s30 + $0xa0] sm:$0xff] }
  0x65   : > { %v679_v60 = vsel %vm678_vm7, %v647_v53, 255  ;;  %v606_v61 = vfloor.f32 %v590_v44  ;;  %v576_v62 = vsub.f32 %v243_v47, %v2107_v17  ;;  %v575_v63 = vsub.f32 %v242_v50, %v2107_v17  ;;  %v1763_v44 = vld [vmem:[%s2150_s30 + $0x98] sm:$0xff] }
  0x66   : > { %715 = vperm.xlu0 %1996, %v675_v56   ;;  %v1905_v0 = vcvt.f32.s32 %v1904_v58  ;;  %v936_v1 = vsub.f32 %v1745_v51, %v2090_v2  ;;  %v935_v3 = vsub.f32 %v1744_v54, %v2090_v2  ;;  %v1249_v4 = vsub.f32 %v1760_v55, %v2107_v17  ;;  %v1747_v47 = vld [vmem:[%s2087_s26 + $0x98] sm:$0xff]  ;;  %v1748_v56 = vld [vmem:[%s2087_s26 + $0xa0] sm:$0xff] }
  0x67   : > { %v1902_v5 = vtrunc.f32 %v606_v61  ;;  %v593_v7 = vmul.f32 %v2158_v8, %v576_v62  ;;  %v592_v9 = vmul.f32 %v2158_v8, %v575_v63  ;;  %v937_v10 = vsub.f32 %v1746_v59, %v2090_v2 }
  0x68   : > { %724 = vperm.xlu1 %1997, %v681_v57   ;;  %vm652_vm8 = vcmp.gt.s32.totalorder %v1905_v0, 0  ;;  %v952_v11 = vmul.f32 %v936_v1, %v2095_v6  ;;  %v951_v12 = vmul.f32 %v935_v3, %v2095_v6  ;;  %v1265_v13 = vmul.f32 %v1249_v4, %v2158_v8 }
  0x69   : > { %v653_v14 = vsel %vm652_vm8, %v1905_v0, 0  ;;  %v1903_v15 = vcvt.f32.s32 %v1902_v5  ;;  %v609_v16 = vfloor.f32 %v593_v7  ;;  %v608_v18 = vfloor.f32 %v592_v9 }
  0x6a   : > { %721 = vperm.xlu0 %1996, %v679_v60   ;;  %vm684_vm9 = vcmp.lt.s32.totalorder %v653_v14, 255  ;;  %v968_v19 = vfloor.f32 %v952_v11  ;;  %v967_v20 = vfloor.f32 %v951_v12  ;;  %v1281_v21 = vfloor.f32 %v1265_v13 }
  0x6b   : > { %v685_v22 = vsel %vm684_vm9, %v653_v14, 255  ;;  %vm650_vm10 = vcmp.gt.s32.totalorder %v1903_v15, 0  ;;  %v1908_v23 = vtrunc.f32 %v609_v16  ;;  %v1906_v24 = vtrunc.f32 %v608_v18  ;;  %v1749_v14 = vld [vmem:[%s2087_s26 + $0xa8] sm:$0xff] }
  0x6c   : > { %730 = vperm.xlu1 %1997, %v685_v22   ;;  %v651_v25 = vsel %vm650_vm10, %v1903_v15, 0  ;;  %v1912_v26 = vtrunc.f32 %v968_v19  ;;  %v1910_v27 = vtrunc.f32 %v967_v20  ;;  %v1942_v28 = vtrunc.f32 %v1281_v21 }
  0x6d   : > { %vm682_vm11 = vcmp.lt.s32.totalorder %v651_v25, 255  ;;  %v1909_v30 = vcvt.f32.s32 %v1908_v23  ;;  %v1907_v31 = vcvt.f32.s32 %v1906_v24  ;;  %v953_v32 = vmul.f32 %v937_v10, %v2095_v6  ;;  %v1765_v10 = vld [vmem:[%s2150_s30 + $0xa8] sm:$0xff] }
  0x6e   : > { %v683_v33 = vsel %vm682_vm11, %v651_v25, 255  ;;  %v1913_v34 = vcvt.f32.s32 %v1912_v26  ;;  %v1911_v35 = vcvt.f32.s32 %v1910_v27  ;;  %v1943_v36 = vcvt.f32.s32 %v1942_v28 }
  0x6f   : > { %727 = vperm.xlu0 %1996, %v683_v33   ;;  %vm656_vm12 = vcmp.gt.s32.totalorder %v1909_v30, 0  ;;  %vm654_vm13 = vcmp.gt.s32.totalorder %v1907_v31, 0  ;;  %v969_v37 = vfloor.f32 %v953_v32  ;;  %v1251_v38 = vsub.f32 %v1762_v29, %v2107_v17 }
  0x70   : > { %v657_v39 = vsel %vm656_vm12, %v1909_v30, 0  ;;  %v655_v40 = vsel %vm654_vm13, %v1907_v31, 0  ;;  %vm1001_vm14 = vcmp.gt.s32.totalorder %v1913_v34, 0  ;;  %vm999_vm15 = vcmp.gt.s32.totalorder %v1911_v35, 0 }
  0x71   : > { %vm688_vm0 = vcmp.lt.s32.totalorder %v657_v39, 255  ;;  %vm686_vm1 = vcmp.lt.s32.totalorder %v655_v40, 255  ;;  %v1002_v41 = vsel %vm1001_vm14, %v1913_v34, 0  ;;  %v1000_v42 = vsel %vm999_vm15, %v1911_v35, 0 }
  0x72   : > { %v689_v45 = vsel %vm688_vm0, %v657_v39, 255  ;;  %v687_v46 = vsel %vm686_vm1, %v655_v40, 255  ;;  %vm1033_vm2 = vcmp.lt.s32.totalorder %v1002_v41, 255  ;;  %vm1031_vm3 = vcmp.lt.s32.totalorder %v1000_v42, 255 }
  0x73   : > { %736 = vperm.xlu1 %1997, %v689_v45   ;;  %733 = vperm.xlu0 %1996, %v687_v46   ;;  %v1034_v49 = vsel %vm1033_vm2, %v1002_v41, 255  ;;  %v1032_v50 = vsel %vm1031_vm3, %v1000_v42, 255  ;;  %vm1313_vm4 = vcmp.gt.s32.totalorder %v1943_v36, 0  ;;  %v1914_v51 = vtrunc.f32 %v969_v37  ;;  %v1750_v37 = vld [vmem:[%s2087_s26 + $0xb0] sm:$0xff]  ;;  %v1767_v41 = vld [vmem:[%s2150_s30 + $0xb8] sm:$0xff] }
  0x74   : > { %v1314_v52 = vsel %vm1313_vm4, %v1943_v36, 0  ;;  %v1267_v53 = vmul.f32 %v1251_v38, %v2158_v8  ;;  %v1250_v54 = vsub.f32 %v1761_v43, %v2107_v17  ;;  %v1252_v55 = vsub.f32 %v1763_v44, %v2107_v17  ;;  %v1766_v36 = vld [vmem:[%s2150_s30 + $0xb0] sm:$0xff]  ;;  %v1751_v42 = vld [vmem:[%s2087_s26 + $0xb8] sm:$0xff] }
  0x75   : > { %vm1345_vm5 = vcmp.lt.s32.totalorder %v1314_v52, 255  ;;  %v1915_v57 = vcvt.f32.s32 %v1914_v51  ;;  %v938_v58 = vsub.f32 %v1747_v47, %v2090_v2  ;;  %v1253_v59 = vsub.f32 %v1764_v48, %v2107_v17 }
  0x76   : > { %v1346_v60 = vsel %vm1345_vm5, %v1314_v52, 255  ;;  %v1283_v61 = vfloor.f32 %v1267_v53  ;;  %v1266_v62 = vmul.f32 %v1250_v54, %v2158_v8  ;;  %v1268_v63 = vmul.f32 %v1252_v55, %v2158_v8 }
  0x77   : > { %1067 = vperm.xlu1 %1997, %v1034_v49   ;;  %1064 = vperm.xlu0 %1996, %v1032_v50   ;;  %vm1003_vm6 = vcmp.gt.s32.totalorder %v1915_v57, 0  ;;  %v954_v0 = vmul.f32 %v938_v58, %v2095_v6  ;;  %v1269_v1 = vmul.f32 %v1253_v59, %v2158_v8  ;;  %v939_v3 = vsub.f32 %v1748_v56, %v2090_v2 }
  0x78   : > { %v1004_v4 = vsel %vm1003_vm6, %v1915_v57, 0  ;;  %v1946_v5 = vtrunc.f32 %v1283_v61  ;;  %v1282_v7 = vfloor.f32 %v1266_v62  ;;  %v1284_v9 = vfloor.f32 %v1268_v63  ;;  %v1768_v57 = vld [vmem:[%s2150_s30 + $0xc0] sm:$0xff] }
  0x79   : > { %vm1035_vm7 = vcmp.lt.s32.totalorder %v1004_v4, 255  ;;  %v970_v11 = vfloor.f32 %v954_v0  ;;  %v1285_v12 = vfloor.f32 %v1269_v1  ;;  %v955_v13 = vmul.f32 %v939_v3, %v2095_v6 }
  0x7a   : > { %v1036_v15 = vsel %vm1035_vm7, %v1004_v4, 255  ;;  %v1947_v16 = vcvt.f32.s32 %v1946_v5  ;;  %v1944_v18 = vtrunc.f32 %v1282_v7  ;;  %v1948_v19 = vtrunc.f32 %v1284_v9 }
  0x7b   : > { %1378 = vperm.xlu1 %1997, %v1346_v60   ;;  %1070 = vperm.xlu0 %1996, %v1036_v15   ;;  %v1916_v20 = vtrunc.f32 %v970_v11  ;;  %v1950_v21 = vtrunc.f32 %v1285_v12  ;;  %v971_v22 = vfloor.f32 %v955_v13  ;;  %v1254_v23 = vsub.f32 %v1765_v10, %v2107_v17 }
  0x7c   : > { %vm1317_vm8 = vcmp.gt.s32.totalorder %v1947_v16, 0  ;;  %v1945_v24 = vcvt.f32.s32 %v1944_v18  ;;  %v1949_v25 = vcvt.f32.s32 %v1948_v19  ;;  %v940_v26 = vsub.f32 %v1749_v14, %v2090_v2  ;;  %v1752_v14 = vld [vmem:[%s2087_s26 + $0xc0] sm:$0xff] }
  0x7d   : > { %v1318_v27 = vsel %vm1317_vm8, %v1947_v16, 0  ;;  %v1917_v28 = vcvt.f32.s32 %v1916_v20  ;;  %v1951_v29 = vcvt.f32.s32 %v1950_v21  ;;  %v1918_v30 = vtrunc.f32 %v971_v22 }
  0x7e   : > { %vm1349_vm9 = vcmp.lt.s32.totalorder %v1318_v27, 255  ;;  %vm1315_vm10 = vcmp.gt.s32.totalorder %v1945_v24, 0  ;;  %vm1319_vm11 = vcmp.gt.s32.totalorder %v1949_v25, 0  ;;  %v1270_v31 = vmul.f32 %v1254_v23, %v2158_v8 }
  0x7f   : > { %v1350_v32 = vsel %vm1349_vm9, %v1318_v27, 255  ;;  %v1316_v33 = vsel %vm1315_vm10, %v1945_v24, 0  ;;  %v1320_v34 = vsel %vm1319_vm11, %v1949_v25, 0  ;;  %vm1005_vm12 = vcmp.gt.s32.totalorder %v1917_v28, 0  ;;  %v1769_v27 = vld [vmem:[%s2150_s30 + $0xc8] sm:$0xff] }
  0x80   : > { %1384 = vperm.xlu1 %1997, %v1350_v32   ;;  %vm1347_vm13 = vcmp.lt.s32.totalorder %v1316_v33, 255  ;;  %vm1351_vm14 = vcmp.lt.s32.totalorder %v1320_v34, 255  ;;  %v1006_v35 = vsel %vm1005_vm12, %v1917_v28, 0  ;;  %vm1321_vm15 = vcmp.gt.s32.totalorder %v1951_v29, 0 }
  0x81   : > { %v1348_v38 = vsel %vm1347_vm13, %v1316_v33, 255  ;;  %v1352_v39 = vsel %vm1351_vm14, %v1320_v34, 255  ;;  %vm1037_vm0 = vcmp.lt.s32.totalorder %v1006_v35, 255  ;;  %v1322_v40 = vsel %vm1321_vm15, %v1951_v29, 0  ;;  %v1753_v29 = vld [vmem:[%s2087_s26 + $0xc8] sm:$0xff]  ;;  %v1754_v34 = vld [vmem:[%s2087_s26 + $0xd0] sm:$0xff] }
  0x82   : > { %1381 = vperm.xlu0 %1996, %v1348_v38   ;;  %v1038_v43 = vsel %vm1037_vm0, %v1006_v35, 255  ;;  %vm1353_vm1 = vcmp.lt.s32.totalorder %v1322_v40, 255  ;;  %v1919_v44 = vcvt.f32.s32 %v1918_v30  ;;  %v1286_v45 = vfloor.f32 %v1270_v31  ;;  %v1770_v30 = vld [vmem:[%s2150_s30 + $0xd0] sm:$0xff]  ;;  %v1771_v35 = vld [vmem:[%s2150_s30 + $0xd8] sm:$0xff] }
  0x83   : > { %v1354_v46 = vsel %vm1353_vm1, %v1322_v40, 255  ;;  %v956_v47 = vmul.f32 %v940_v26, %v2095_v6  ;;  %v1255_v48 = vsub.f32 %v1766_v36, %v2107_v17  ;;  %v941_v49 = vsub.f32 %v1750_v37, %v2090_v2 }
  0x84   : > { %1387 = vperm.xlu1 %1997, %v1352_v39   ;;  %vm1007_vm2 = vcmp.gt.s32.totalorder %v1919_v44, 0  ;;  %v1952_v50 = vtrunc.f32 %v1286_v45  ;;  %v1256_v51 = vsub.f32 %v1767_v41, %v2107_v17  ;;  %v942_v52 = vsub.f32 %v1751_v42, %v2090_v2  ;;  %v1755_v39 = vld [vmem:[%s2087_s26 + $0xd8] sm:$0xff] }
  0x85   : > { %v1008_v53 = vsel %vm1007_vm2, %v1919_v44, 0  ;;  %v972_v54 = vfloor.f32 %v956_v47  ;;  %v1271_v55 = vmul.f32 %v1255_v48, %v2158_v8  ;;  %v957_v56 = vmul.f32 %v941_v49, %v2095_v6 }
  0x86   : > { %1073 = vperm.xlu0 %1996, %v1038_v43   ;;  %vm1039_vm3 = vcmp.lt.s32.totalorder %v1008_v53, 255  ;;  %v1953_v58 = vcvt.f32.s32 %v1952_v50  ;;  %v1272_v59 = vmul.f32 %v1256_v51, %v2158_v8  ;;  %v958_v60 = vmul.f32 %v942_v52, %v2095_v6 }
  0x87   : > { %v1040_v61 = vsel %vm1039_vm3, %v1008_v53, 255  ;;  %v1920_v62 = vtrunc.f32 %v972_v54  ;;  %v1287_v63 = vfloor.f32 %v1271_v55  ;;  %v973_v0 = vfloor.f32 %v957_v56 }
  0x88   : > { %1390 = vperm.xlu1 %1997, %v1354_v46   ;;  %vm1323_vm4 = vcmp.gt.s32.totalorder %v1953_v58, 0  ;;  %v1288_v1 = vfloor.f32 %v1272_v59  ;;  %v974_v3 = vfloor.f32 %v958_v60  ;;  %v1257_v4 = vsub.f32 %v1768_v57, %v2107_v17 }
  0x89   : > { %v1324_v5 = vsel %vm1323_vm4, %v1953_v58, 0  ;;  %v1921_v7 = vcvt.f32.s32 %v1920_v62  ;;  %v1954_v9 = vtrunc.f32 %v1287_v63  ;;  %v1922_v10 = vtrunc.f32 %v973_v0 }
  0x8a   : > { %1076 = vperm.xlu0 %1996, %v1040_v61   ;;  %vm1355_vm5 = vcmp.lt.s32.totalorder %v1324_v5, 255  ;;  %v1956_v11 = vtrunc.f32 %v1288_v1  ;;  %v1924_v12 = vtrunc.f32 %v974_v3  ;;  %v1273_v13 = vmul.f32 %v1257_v4, %v2158_v8 }
  0x8b   : > { %v1356_v15 = vsel %vm1355_vm5, %v1324_v5, 255  ;;  %vm1009_vm6 = vcmp.gt.s32.totalorder %v1921_v7, 0  ;;  %v1955_v16 = vcvt.f32.s32 %v1954_v9  ;;  %v1923_v18 = vcvt.f32.s32 %v1922_v10 }
  0x8c   : > { %1393 = vperm.xlu1 %1997, %v1356_v15   ;;  %v1010_v19 = vsel %vm1009_vm6, %v1921_v7, 0  ;;  %v1957_v20 = vcvt.f32.s32 %v1956_v11  ;;  %v1925_v21 = vcvt.f32.s32 %v1924_v12  ;;  %v1289_v22 = vfloor.f32 %v1273_v13 }
  0x8d   : > { %vm1041_vm7 = vcmp.lt.s32.totalorder %v1010_v19, 255  ;;  %vm1325_vm8 = vcmp.gt.s32.totalorder %v1955_v16, 0  ;;  %vm1011_vm9 = vcmp.gt.s32.totalorder %v1923_v18, 0  ;;  %v943_v23 = vsub.f32 %v1752_v14, %v2090_v2 }
  0x8e   : > { %v1042_v24 = vsel %vm1041_vm7, %v1010_v19, 255  ;;  %v1326_v25 = vsel %vm1325_vm8, %v1955_v16, 0  ;;  %v1012_v26 = vsel %vm1011_vm9, %v1923_v18, 0  ;;  %vm1327_vm10 = vcmp.gt.s32.totalorder %v1957_v20, 0 }
  0x8f   : > { %1079 = vperm.xlu0 %1996, %v1042_v24   ;;  %vm1357_vm11 = vcmp.lt.s32.totalorder %v1326_v25, 255  ;;  %vm1043_vm12 = vcmp.lt.s32.totalorder %v1012_v26, 255  ;;  %v1328_v28 = vsel %vm1327_vm10, %v1957_v20, 0  ;;  %vm1013_vm13 = vcmp.gt.s32.totalorder %v1925_v21, 0  ;;  %v1772_v20 = vld [vmem:[%s2150_s30 + $0xe0] sm:$0xff]  ;;  %v1757_v24 = vld [vmem:[%s2087_s26 + $0xe8] sm:$0xff] }
  0x90   : > { %v1358_v31 = vsel %vm1357_vm11, %v1326_v25, 255  ;;  %v1044_v32 = vsel %vm1043_vm12, %v1012_v26, 255  ;;  %vm1359_vm14 = vcmp.lt.s32.totalorder %v1328_v28, 255  ;;  %v1014_v33 = vsel %vm1013_vm13, %v1925_v21, 0  ;;  %v1756_v21 = vld [vmem:[%s2087_s26 + $0xe0] sm:$0xff] }
  0x91   : > { %1396 = vperm.xlu1 %1997, %v1358_v31   ;;  %v1360_v36 = vsel %vm1359_vm14, %v1328_v28, 255  ;;  %vm1045_vm15 = vcmp.lt.s32.totalorder %v1014_v33, 255  ;;  %v1958_v37 = vtrunc.f32 %v1289_v22  ;;  %v959_v38 = vmul.f32 %v943_v23, %v2095_v6  ;;  %v1773_v23 = vld [vmem:[%s2150_s30 + $0xe8] sm:$0xff]  ;;  %v1774_v28 = vld [vmem:[%s2150_s30 + $0xf0] sm:$0xff] }
  0x92   : > { %v1046_v40 = vsel %vm1045_vm15, %v1014_v33, 255  ;;  %v1258_v41 = vsub.f32 %v1769_v27, %v2107_v17  ;;  %v944_v42 = vsub.f32 %v1753_v29, %v2090_v2  ;;  %v1259_v43 = vsub.f32 %v1770_v30, %v2107_v17 }
  0x93   : > { %1082 = vperm.xlu0 %1996, %v1044_v32   ;;  %v1959_v44 = vcvt.f32.s32 %v1958_v37  ;;  %v975_v45 = vfloor.f32 %v959_v38  ;;  %v945_v46 = vsub.f32 %v1754_v34, %v2090_v2  ;;  %v1260_v47 = vsub.f32 %v1771_v35, %v2107_v17 }
  0x94   : > { %v1274_v48 = vmul.f32 %v1258_v41, %v2158_v8  ;;  %v960_v49 = vmul.f32 %v944_v42, %v2095_v6  ;;  %v1275_v50 = vmul.f32 %v1259_v43, %v2158_v8  ;;  %v946_v51 = vsub.f32 %v1755_v39, %v2090_v2 }
  0x95   : > { %1399 = vperm.xlu1 %1997, %v1360_v36   ;;  %vm1329_vm0 = vcmp.gt.s32.totalorder %v1959_v44, 0  ;;  %v1926_v52 = vtrunc.f32 %v975_v45  ;;  %v961_v53 = vmul.f32 %v945_v46, %v2095_v6  ;;  %v1276_v54 = vmul.f32 %v1260_v47, %v2158_v8  ;;  %v1758_v36 = vld [vmem:[%s2087_s26 + $0xf0] sm:$0xff] }
  0x96   : > { %v1330_v55 = vsel %vm1329_vm0, %v1959_v44, 0  ;;  %v1290_v56 = vfloor.f32 %v1274_v48  ;;  %v976_v57 = vfloor.f32 %v960_v49  ;;  %v1291_v58 = vfloor.f32 %v1275_v50 }
  0x97   : > { %1085 = vperm.xlu0 %1996, %v1046_v40   ;;  %vm1361_vm1 = vcmp.lt.s32.totalorder %v1330_v55, 255  ;;  %v1927_v59 = vcvt.f32.s32 %v1926_v52  ;;  %v977_v60 = vfloor.f32 %v961_v53  ;;  %v1292_v61 = vfloor.f32 %v1276_v54 }
  0x98   : > { %v1362_v62 = vsel %vm1361_vm1, %v1330_v55, 255  ;;  %v1960_v63 = vtrunc.f32 %v1290_v56  ;;  %v1928_v0 = vtrunc.f32 %v976_v57  ;;  %v1962_v1 = vtrunc.f32 %v1291_v58  ;;  %v1759_v55 = vld [vmem:[%s2087_s26 + $0xf8] sm:$0xff] }
  0x99   : > { %1402 = vperm.xlu1 %1997, %v1362_v62   ;;  %vm1015_vm2 = vcmp.gt.s32.totalorder %v1927_v59, 0  ;;  %v1930_v3 = vtrunc.f32 %v977_v60  ;;  %v1964_v4 = vtrunc.f32 %v1292_v61  ;;  %v962_v5 = vmul.f32 %v946_v51, %v2095_v6  ;;  %v1775_v51 = vld [vmem:[%s2150_s30 + $0xf8] sm:$0xff] }
  0x9a   : > { %v1016_v7 = vsel %vm1015_vm2, %v1927_v59, 0  ;;  %v1961_v9 = vcvt.f32.s32 %v1960_v63  ;;  %v1929_v10 = vcvt.f32.s32 %v1928_v0  ;;  %v1963_v11 = vcvt.f32.s32 %v1962_v1 }
  0x9b   : > { %vm1047_vm3 = vcmp.lt.s32.totalorder %v1016_v7, 255  ;;  %v1931_v12 = vcvt.f32.s32 %v1930_v3  ;;  %v1965_v13 = vcvt.f32.s32 %v1964_v4  ;;  %v978_v14 = vfloor.f32 %v962_v5 }
  0x9c   : > { %v1048_v15 = vsel %vm1047_vm3, %v1016_v7, 255  ;;  %vm1331_vm4 = vcmp.gt.s32.totalorder %v1961_v9, 0  ;;  %vm1017_vm5 = vcmp.gt.s32.totalorder %v1929_v10, 0  ;;  %vm1333_vm6 = vcmp.gt.s32.totalorder %v1963_v11, 0 }
  0x9d   : > { %1088 = vperm.xlu0 %1996, %v1048_v15   ;;  %v1332_v16 = vsel %vm1331_vm4, %v1961_v9, 0  ;;  %v1018_v18 = vsel %vm1017_vm5, %v1929_v10, 0  ;;  %v1334_v19 = vsel %vm1333_vm6, %v1963_v11, 0  ;;  %vm1019_vm7 = vcmp.gt.s32.totalorder %v1931_v12, 0 }
  0x9e   : > { %vm1363_vm8 = vcmp.lt.s32.totalorder %v1332_v16, 255  ;;  %vm1049_vm9 = vcmp.lt.s32.totalorder %v1018_v18, 255  ;;  %vm1365_vm10 = vcmp.lt.s32.totalorder %v1334_v19, 255  ;;  %v1020_v22 = vsel %vm1019_vm7, %v1931_v12, 0 }
  0x9f   : > { %v1364_v25 = vsel %vm1363_vm8, %v1332_v16, 255  ;;  %v1050_v26 = vsel %vm1049_vm9, %v1018_v18, 255  ;;  %v1366_v27 = vsel %vm1365_vm10, %v1334_v19, 255  ;;  %vm1051_vm11 = vcmp.lt.s32.totalorder %v1020_v22, 255 }
  0xa0   : > { %1405 = vperm.xlu1 %1997, %v1364_v25   ;;  %v1052_v29 = vsel %vm1051_vm11, %v1020_v22, 255  ;;  %vm1335_vm12 = vcmp.gt.s32.totalorder %v1965_v13, 0  ;;  %v1932_v30 = vtrunc.f32 %v978_v14  ;;  %v1261_v31 = vsub.f32 %v1772_v20, %v2107_v17 }
  0xa1   : > { %1091 = vperm.xlu0 %1996, %v1050_v26   ;;  %v1336_v32 = vsel %vm1335_vm12, %v1965_v13, 0  ;;  %v947_v33 = vsub.f32 %v1756_v21, %v2090_v2  ;;  %v1262_v34 = vsub.f32 %v1773_v23, %v2107_v17  ;;  %v948_v35 = vsub.f32 %v1757_v24, %v2090_v2 }
  0xa2   : > { %vm1367_vm13 = vcmp.lt.s32.totalorder %v1336_v32, 255  ;;  %v1933_v37 = vcvt.f32.s32 %v1932_v30  ;;  %v1277_v38 = vmul.f32 %v1261_v31, %v2158_v8  ;;  %v1263_v39 = vsub.f32 %v1774_v28, %v2107_v17 }
  0xa3   : > { %v1368_v40 = vsel %vm1367_vm13, %v1336_v32, 255  ;;  %v963_v41 = vmul.f32 %v947_v33, %v2095_v6  ;;  %v1278_v42 = vmul.f32 %v1262_v34, %v2158_v8  ;;  %v964_v43 = vmul.f32 %v948_v35, %v2095_v6 }
  0xa4   : > { %1408 = vperm.xlu1 %1997, %v1366_v27   ;;  %vm1021_vm14 = vcmp.gt.s32.totalorder %v1933_v37, 0  ;;  %v1293_v44 = vfloor.f32 %v1277_v38  ;;  %v1279_v45 = vmul.f32 %v1263_v39, %v2158_v8  ;;  %v949_v46 = vsub.f32 %v1758_v36, %v2090_v2 }
  0xa5   : > { %1094 = vperm.xlu0 %1996, %v1052_v29   ;;  %v1022_v47 = vsel %vm1021_vm14, %v1933_v37, 0  ;;  %v979_v48 = vfloor.f32 %v963_v41  ;;  %v1294_v49 = vfloor.f32 %v1278_v42  ;;  %v980_v50 = vfloor.f32 %v964_v43 }
  0xa6   : > { %vm1053_vm15 = vcmp.lt.s32.totalorder %v1022_v47, 255  ;;  %v1966_v52 = vtrunc.f32 %v1293_v44  ;;  %v1295_v53 = vfloor.f32 %v1279_v45  ;;  %v965_v54 = vmul.f32 %v949_v46, %v2095_v6 }
  0xa7   : > { %v1054_v56 = vsel %vm1053_vm15, %v1022_v47, 255  ;;  %v1934_v57 = vtrunc.f32 %v979_v48  ;;  %v1968_v58 = vtrunc.f32 %v1294_v49  ;;  %v1936_v59 = vtrunc.f32 %v980_v50 }
  0xa8   : > { %1411 = vperm.xlu1 %1997, %v1368_v40   ;;  %v1967_v60 = vcvt.f32.s32 %v1966_v52  ;;  %v1970_v61 = vtrunc.f32 %v1295_v53  ;;  %v981_v62 = vfloor.f32 %v965_v54  ;;  %v1264_v63 = vsub.f32 %v1775_v51, %v2107_v17 }
  0xa9   : > { %1097 = vperm.xlu0 %1996, %v1054_v56   ;;  %v1935_v0 = vcvt.f32.s32 %v1934_v57  ;;  %v1969_v1 = vcvt.f32.s32 %v1968_v58  ;;  %v1937_v3 = vcvt.f32.s32 %v1936_v59  ;;  %v950_v4 = vsub.f32 %v1759_v55, %v2090_v2 }
  0xaa   : > { %vm1337_vm0 = vcmp.gt.s32.totalorder %v1967_v60, 0  ;;  %v1971_v5 = vcvt.f32.s32 %v1970_v61  ;;  %v1938_v7 = vtrunc.f32 %v981_v62  ;;  %v1280_v9 = vmul.f32 %v1264_v63, %v2158_v8 }
  0xab   : > { %v1338_v10 = vsel %vm1337_vm0, %v1967_v60, 0  ;;  %vm1023_vm1 = vcmp.gt.s32.totalorder %v1935_v0, 0  ;;  %vm1339_vm2 = vcmp.gt.s32.totalorder %v1969_v1, 0  ;;  %vm1025_vm3 = vcmp.gt.s32.totalorder %v1937_v3, 0 }
  0xac   : > { %vm1369_vm4 = vcmp.lt.s32.totalorder %v1338_v10, 255  ;;  %v1024_v11 = vsel %vm1023_vm1, %v1935_v0, 0  ;;  %v1340_v12 = vsel %vm1339_vm2, %v1969_v1, 0  ;;  %v1026_v13 = vsel %vm1025_vm3, %v1937_v3, 0 }
  0xad   : > { %v1370_v17 = vsel %vm1369_vm4, %v1338_v10, 255  ;;  %vm1055_vm5 = vcmp.lt.s32.totalorder %v1024_v11, 255  ;;  %vm1371_vm6 = vcmp.lt.s32.totalorder %v1340_v12, 255  ;;  %vm1057_vm7 = vcmp.lt.s32.totalorder %v1026_v13, 255 }
  0xae   : > { %1414 = vperm.xlu1 %1997, %v1370_v17   ;;  %v1056_v14 = vsel %vm1055_vm5, %v1024_v11, 255  ;;  %v1372_v2 = vsel %vm1371_vm6, %v1340_v12, 255  ;;  %vm1341_vm8 = vcmp.gt.s32.totalorder %v1971_v5, 0  ;;  %v1939_v16 = vcvt.f32.s32 %v1938_v7 }
  0xaf   : > { %1100 = vperm.xlu0 %1996, %v1056_v14   ;;  %v1342_v15 = vsel %vm1341_vm8, %v1971_v5, 0  ;;  %v1296_v8 = vfloor.f32 %v1280_v9  ;;  %v966_v18 = vmul.f32 %v950_v4, %v2095_v6  ;;  %v1058_v19 = vsel %vm1057_vm7, %v1026_v13, 255 }
  0xb0   : > { %vm1373_vm9 = vcmp.lt.s32.totalorder %v1342_v15, 255  ;;  %v209_v20 = vlaneseq  ;;  %vm1027_vm10 = vcmp.gt.s32.totalorder %v1939_v16, 0  ;;  %v2027_v37 = vmov 0.0  }
  0xb1   : > { %v1972_v21 = vtrunc.f32 %v1296_v8  ;;  %v982_v22 = vfloor.f32 %v966_v18  ;;  %v382_v23 = vpop.permute.xlu1 %381  ;;  %v376_v24 = vpop.permute.xlu0 %375  ;;  %v1028_v25 = vsel %vm1027_vm10, %v1939_v16, 0  ;;  %v1374_v27 = vsel %vm1373_vm9, %v1342_v15, 255 }
  0xb2   : > { %1417 = vperm.xlu1 %1997, %v1372_v2   ;;  %v2300_v26 = vand.u32 127, %v209_v20  ;;  %vm1059_vm11 = vcmp.lt.s32.totalorder %v1028_v25, 255 }
  0xb3   : > { %1103 = vperm.xlu0 %1996, %v1058_v19   ;;  %v1973_v28 = vcvt.f32.s32 %v1972_v21  ;;  %v1940_v29 = vtrunc.f32 %v982_v22  ;;  %v1060_v30 = vsel %vm1059_vm11, %v1028_v25, 255 }
  0xb4   : > { %v2303_v6 = vadd.s32 128, %v2300_v26  ;;  %vm422_vm13 = vcmp.eq.s32.totalorder %v376_v24, %v2300_v26  ;;  %vm426_vm1 = vcmp.eq.s32.totalorder %v382_v23, %v2300_v26 }
  0xb5   : > { %vm1343_vm12 = vcmp.gt.s32.totalorder %v1973_v28, 0  ;;  %v1941_v31 = vcvt.f32.s32 %v1940_v29  ;;  %v385_v32 = vpop.permute.xlu1 %384  ;;  %v379_v33 = vpop.permute.xlu0 %378  ;;  %v1680_v38 = vsel %vm422_vm13, 1.0, %v2027_v37  ;;  %v1684_v47 = vsel %vm426_vm1, 1.0, %v2027_v37 }
  0xb6   : > { %1420 = vperm.xlu1 %1997, %v1374_v27   ;;  %v1344_v34 = vsel %vm1343_vm12, %v1973_v28, 0  ;;  %vm423_vm0 = vcmp.eq.s32.totalorder %v376_v24, %v2303_v6  ;;  %vm427_vm3 = vcmp.eq.s32.totalorder %v382_v23, %v2303_v6  ;;  %vm424_vm4 = vcmp.eq.s32.totalorder %v379_v33, %v2300_v26 }
  0xb7   : > { %1106 = vperm.xlu0 %1996, %v1060_v30   ;;  %vm1375_vm14 = vcmp.lt.s32.totalorder %v1344_v34, 255  ;;  %vm1029_vm15 = vcmp.gt.s32.totalorder %v1941_v31, 0  ;;  %vm425_vm5 = vcmp.eq.s32.totalorder %v379_v33, %v2303_v6  ;;  %v1681_v42 = vsel %vm423_vm0, 1.0, %v2027_v37 }
  0xb8   : > { %v1376_v35 = vsel %vm1375_vm14, %v1344_v34, 255  ;;  %v1030_v36 = vsel %vm1029_vm15, %v1941_v31, 0  ;;  %v1682_v43 = vsel %vm424_vm4, 1.0, %v2027_v37  ;;  %v1683_v44 = vsel %vm425_vm5, 1.0, %v2027_v37 }
  0xb9   : > { %vm1061_vm2 = vcmp.lt.s32.totalorder %v1030_v36, 255  ;;  %v391_v39 = vpop.permute.xlu1 %390  ;;  %v388_v40 = vpop.permute.xlu0 %387  ;;  %vm428_vm6 = vcmp.eq.s32.totalorder %v385_v32, %v2300_v26  ;;  %vm429_vm7 = vcmp.eq.s32.totalorder %v385_v32, %v2303_v6  ;;  %v518_v45 = vadd.f32 %v1682_v43, %v1680_v38 }
  0xba   : > { %1423 = vperm.xlu1 %1997, %v1376_v35   ;;  %v1062_v41 = vsel %vm1061_vm2, %v1030_v36, 255  ;;  %v539_v46 = vadd.f32 %v1683_v44, %v1681_v42  ;;  %v1685_v48 = vsel %vm427_vm3, 1.0, %v2027_v37  ;;  %vm430_vm8 = vcmp.eq.s32.totalorder %v388_v40, %v2300_v26 }
  0xbb   : > { %1109 = vperm.xlu0 %1996, %v1062_v41   ;;  %v519_v49 = vadd.f32 %v1684_v47, %v518_v45  ;;  %vm431_vm9 = vcmp.eq.s32.totalorder %v388_v40, %v2303_v6  ;;  %v1686_v53 = vsel %vm428_vm6, 1.0, %v2027_v37  ;;  %v1687_v54 = vsel %vm429_vm7, 1.0, %v2027_v37 }
  0xbc   : > { %v540_v50 = vadd.f32 %v1685_v48, %v539_v46  ;;  %vm432_vm10 = vcmp.eq.s32.totalorder %v391_v39, %v2300_v26  ;;  %vm433_vm11 = vcmp.eq.s32.totalorder %v391_v39, %v2303_v6  ;;  %v1688_v57 = vsel %vm430_vm8, 1.0, %v2027_v37 }
  0xbd   : > { %v397_v51 = vpop.permute.xlu1 %396  ;;  %v394_v52 = vpop.permute.xlu0 %393  ;;  %v520_v55 = vadd.f32 %v1686_v53, %v519_v49  ;;  %v1689_v58 = vsel %vm431_vm9, 1.0, %v2027_v37  ;;  %v1690_v62 = vsel %vm432_vm10, 1.0, %v2027_v37  ;;  %v1691_v63 = vsel %vm433_vm11, 1.0, %v2027_v37 }
  0xbe   : > { %v541_v56 = vadd.f32 %v1687_v54, %v540_v50  ;;  %vm434_vm12 = vcmp.eq.s32.totalorder %v394_v52, %v2300_v26  ;;  %vm435_vm13 = vcmp.eq.s32.totalorder %v394_v52, %v2303_v6  ;;  %vm436_vm14 = vcmp.eq.s32.totalorder %v397_v51, %v2300_v26 }
  0xbf   : > { %v521_v59 = vadd.f32 %v1688_v57, %v520_v55  ;;  %vm437_vm15 = vcmp.eq.s32.totalorder %v397_v51, %v2303_v6  ;;  %v1692_v4 = vsel %vm434_vm12, 1.0, %v2027_v37  ;;  %v1693_v5 = vsel %vm435_vm13, 1.0, %v2027_v37 }
  0xc0   : > { %v542_v60 = vadd.f32 %v1689_v58, %v541_v56  ;;  %v1694_v11 = vsel %vm436_vm14, 1.0, %v2027_v37  ;;  %v1695_v12 = vsel %vm437_vm15, 1.0, %v2027_v37 }
  0xc1   : > { %v403_v61 = vpop.permute.xlu1 %402  ;;  %v522_v0 = vadd.f32 %v1690_v62, %v521_v59 }
  0xc2   : > { %v543_v1 = vadd.f32 %v1691_v63, %v542_v60  ;;  %vm440_vm2 = vcmp.eq.s32.totalorder %v403_v61, %v2300_v26  ;;  %vm441_vm3 = vcmp.eq.s32.totalorder %v403_v61, %v2303_v6 }
  0xc3   : > { %v400_v3 = vpop.permute.xlu0 %399  ;;  %v523_v7 = vadd.f32 %v1692_v4, %v522_v0  ;;  %v1698_v22 = vsel %vm440_vm2, 1.0, %v2027_v37  ;;  %v1699_v23 = vsel %vm441_vm3, 1.0, %v2027_v37 }
  0xc4   : > { %v544_v9 = vadd.f32 %v1693_v5, %v543_v1  ;;  %vm438_vm0 = vcmp.eq.s32.totalorder %v400_v3, %v2300_v26  ;;  %vm439_vm1 = vcmp.eq.s32.totalorder %v400_v3, %v2303_v6 }
  0xc5   : > { %v409_v10 = vpop.permute.xlu1 %408  ;;  %v524_v13 = vadd.f32 %v1694_v11, %v523_v7  ;;  %v1696_v15 = vsel %vm438_vm0, 1.0, %v2027_v37  ;;  %v1697_v16 = vsel %vm439_vm1, 1.0, %v2027_v37 }
  0xc6   : > { %v545_v17 = vadd.f32 %v1695_v12, %v544_v9  ;;  %vm444_vm6 = vcmp.eq.s32.totalorder %v409_v10, %v2300_v26  ;;  %vm445_vm7 = vcmp.eq.s32.totalorder %v409_v10, %v2303_v6 }
  0xc7   : > { %v406_v14 = vpop.permute.xlu0 %405  ;;  %v525_v8 = vadd.f32 %v1696_v15, %v524_v13  ;;  %v1702_v39 = vsel %vm444_vm6, 1.0, %v2027_v37  ;;  %v1703_v40 = vsel %vm445_vm7, 1.0, %v2027_v37 }
  0xc8   : > { %v546_v18 = vadd.f32 %v1697_v16, %v545_v17  ;;  %vm442_vm4 = vcmp.eq.s32.totalorder %v406_v14, %v2300_v26  ;;  %vm443_vm5 = vcmp.eq.s32.totalorder %v406_v14, %v2303_v6 }
  0xc9   : > { %v2343_v2 = vpop.permute.xlu1 %414  ;;  %v526_v24 = vadd.f32 %v1698_v22, %v525_v8  ;;  %v1700_v28 = vsel %vm442_vm4, 1.0, %v2027_v37  ;;  %v1701_v29 = vsel %vm443_vm5, 1.0, %v2027_v37 }
  0xca   : > { %v547_v25 = vadd.f32 %v1699_v23, %v546_v18  ;;  %vm448_vm2 = vcmp.eq.s32.totalorder %v2343_v2, %v2300_v26  ;;  %vm449_vm3 = vcmp.eq.s32.totalorder %v2343_v2, %v2303_v6 }
  0xcb   : > { %v412_v19 = vpop.permute.xlu0 %411  ;;  %v527_v31 = vadd.f32 %v1700_v28, %v526_v24  ;;  %v1706_v61 = vsel %vm448_vm2, 1.0, %v2027_v37  ;;  %v1707_v62 = vsel %vm449_vm3, 1.0, %v2027_v37 }
  0xcc   : > { %v548_v32 = vadd.f32 %v1701_v29, %v547_v25  ;;  %vm446_vm12 = vcmp.eq.s32.totalorder %v412_v19, %v2300_v26  ;;  %vm447_vm13 = vcmp.eq.s32.totalorder %v412_v19, %v2303_v6 }
  0xcd   : > { %v2349_v21 = vpop.permute.xlu1 %420  ;;  %v528_v42 = vadd.f32 %v1702_v39, %v527_v31  ;;  %v1704_v52 = vsel %vm446_vm12, 1.0, %v2027_v37  ;;  %v1705_v53 = vsel %vm447_vm13, 1.0, %v2027_v37 }
  0xce   : > { %v549_v43 = vadd.f32 %v1703_v40, %v548_v32 }
  0xcf   : > { %v2355_v27 = vpop.permute.xlu0 %417  ;;  %v529_v57 = vadd.f32 %v1704_v52, %v528_v42 }
  0xd0   : > { %v550_v58 = vadd.f32 %v1705_v53, %v549_v43 }
  0xd1   : > { %v530_v5 = vadd.f32 %v1706_v61, %v529_v57 }
  0xd2   : > { %v695_v30 = vpop.permute.xlu1 %694  ;;  %v551_v7 = vadd.f32 %v1707_v62, %v550_v58 }
  0xd3   : > { %vm740_vm8 = vcmp.eq.s32.totalorder %v695_v30, %v2300_v26  ;;  %vm741_vm9 = vcmp.eq.s32.totalorder %v695_v30, %v2303_v6  ;;  %v692_v33 = vpop.permute.xlu0 %691 }
  0xd4   : > { %v1714_v34 = vsel %vm740_vm8, 1.0, %v2027_v37  ;;  %v1715_v35 = vsel %vm741_vm9, 1.0, %v2027_v37  ;;  %vm738_vm10 = vcmp.eq.s32.totalorder %v692_v33, %v2300_v26  ;;  %vm739_vm11 = vcmp.eq.s32.totalorder %v692_v33, %v2303_v6 }
  0xd5   : > { %v1712_v36 = vsel %vm738_vm10, 1.0, %v2027_v37  ;;  %v1713_v38 = vsel %vm739_vm11, 1.0, %v2027_v37  ;;  %vm452_vm8 = vcmp.eq.s32.totalorder %v2349_v21, %v2300_v26  ;;  %vm453_vm9 = vcmp.eq.s32.totalorder %v2349_v21, %v2303_v6 }
  0xd6   : > { %v701_v41 = vpop.permute.xlu1 %700  ;;  %v834_v44 = vadd.f32 %v1714_v34, %v1712_v36  ;;  %v855_v45 = vadd.f32 %v1715_v35, %v1713_v38  ;;  %vm450_vm10 = vcmp.eq.s32.totalorder %v2355_v27, %v2300_v26  ;;  %vm451_vm11 = vcmp.eq.s32.totalorder %v2355_v27, %v2303_v6 }
  0xd7   : > { %v698_v46 = vpop.permute.xlu0 %697  ;;  %vm744_vm14 = vcmp.eq.s32.totalorder %v701_v41, %v2300_v26  ;;  %vm745_vm15 = vcmp.eq.s32.totalorder %v701_v41, %v2303_v6  ;;  %v1708_v17 = vsel %vm450_vm10, 1.0, %v2027_v37  ;;  %v1709_v14 = vsel %vm451_vm11, 1.0, %v2027_v37 }
  0xd8   : > { %vm742_vm0 = vcmp.eq.s32.totalorder %v698_v46, %v2300_v26  ;;  %vm743_vm1 = vcmp.eq.s32.totalorder %v698_v46, %v2303_v6  ;;  %v1718_v54 = vsel %vm744_vm14, 1.0, %v2027_v37  ;;  %v1719_v55 = vsel %vm745_vm15, 1.0, %v2027_v37 }
  0xd9   : > { %v1716_v47 = vsel %vm742_vm0, 1.0, %v2027_v37  ;;  %v1717_v48 = vsel %vm743_vm1, 1.0, %v2027_v37  ;;  %v531_v8 = vadd.f32 %v1708_v17, %v530_v5  ;;  %v552_v18 = vadd.f32 %v1709_v14, %v551_v7 }
  0xda   : > { %v835_v49 = vadd.f32 %v1716_v47, %v834_v44  ;;  %v856_v50 = vadd.f32 %v1717_v48, %v855_v45  ;;  %v707_v51 = vpop.permute.xlu1 %706  ;;  %v1710_v29 = vsel %vm452_vm8, 1.0, %v2027_v37  ;;  %v1711_v30 = vsel %vm453_vm9, 1.0, %v2027_v37 }
  0xdb   : > { %v704_v56 = vpop.permute.xlu0 %703  ;;  %vm748_vm6 = vcmp.eq.s32.totalorder %v707_v51, %v2300_v26  ;;  %vm749_vm7 = vcmp.eq.s32.totalorder %v707_v51, %v2303_v6  ;;  %v532_v34 = vadd.f32 %v1710_v29, %v531_v8  ;;  %v553_v35 = vadd.f32 %v1711_v30, %v552_v18 }
  0xdc   : > { %v836_v59 = vadd.f32 %v1718_v54, %v835_v49  ;;  %v857_v60 = vadd.f32 %v1719_v55, %v856_v50  ;;  %vm746_vm4 = vcmp.eq.s32.totalorder %v704_v56, %v2300_v26  ;;  %vm747_vm5 = vcmp.eq.s32.totalorder %v704_v56, %v2303_v6 }
  0xdd   : > { %v1720_v63 = vsel %vm746_vm4, 1.0, %v2027_v37  ;;  %v1721_v0 = vsel %vm747_vm5, 1.0, %v2027_v37  ;;  %v1722_v9 = vsel %vm748_vm6, 1.0, %v2027_v37  ;;  %v1723_v10 = vsel %vm749_vm7, 1.0, %v2027_v37 }
  0xde   : > { %v713_v1 = vpop.permute.xlu1 %712  ;;  %v837_v3 = vadd.f32 %v1720_v63, %v836_v59  ;;  %v858_v4 = vadd.f32 %v1721_v0, %v857_v60  ;;  %v533_v50 = vrot.slane %v532_v34, 4  ;;  %v554_v51 = vrot.slane %v553_v35, 4 }
  0xdf   : > { %vm752_vm12 = vcmp.eq.s32.totalorder %v713_v1, %v2300_v26  ;;  %vm753_vm13 = vcmp.eq.s32.totalorder %v713_v1, %v2303_v6 }
  0xe0   : > { %v838_v12 = vadd.f32 %v1722_v9, %v837_v3  ;;  %v859_v13 = vadd.f32 %v1723_v10, %v858_v4  ;;  %v1726_v23 = vsel %vm752_vm12, 1.0, %v2027_v37  ;;  %v1727_v24 = vsel %vm753_vm13, 1.0, %v2027_v37 }
  0xe1   : > { %v710_v11 = vpop.permute.xlu0 %709  ;;  %v534_v63 = vadd.f32 %v533_v50, %v532_v34  ;;  %v555_v0 = vadd.f32 %v554_v51, %v553_v35 }
  0xe2   : > { %vm750_vm14 = vcmp.eq.s32.totalorder %v710_v11, %v2300_v26  ;;  %vm751_vm15 = vcmp.eq.s32.totalorder %v710_v11, %v2303_v6 }
  0xe3   : > { %v1724_v2 = vsel %vm750_vm14, 1.0, %v2027_v37  ;;  %v1725_v15 = vsel %vm751_vm15, 1.0, %v2027_v37  ;;  %v719_v16 = vpop.permute.xlu1 %718  ;;  %v535_v17 = vrot.slane %v534_v63, 2  ;;  %v556_v14 = vrot.slane %v555_v0, 2 }
  0xe4   : > { %v839_v19 = vadd.f32 %v1724_v2, %v838_v12  ;;  %v860_v22 = vadd.f32 %v1725_v15, %v859_v13  ;;  %vm756_vm0 = vcmp.eq.s32.totalorder %v719_v16, %v2300_v26  ;;  %vm757_vm1 = vcmp.eq.s32.totalorder %v719_v16, %v2303_v6 }
  0xe5   : > { %v716_v25 = vpop.permute.xlu0 %715  ;;  %v1730_v39 = vsel %vm756_vm0, 1.0, %v2027_v37  ;;  %v1731_v40 = vsel %vm757_vm1, 1.0, %v2027_v37 }
  0xe6   : > { %v840_v27 = vadd.f32 %v1726_v23, %v839_v19  ;;  %v861_v28 = vadd.f32 %v1727_v24, %v860_v22  ;;  %vm754_vm2 = vcmp.eq.s32.totalorder %v716_v25, %v2300_v26  ;;  %vm755_vm3 = vcmp.eq.s32.totalorder %v716_v25, %v2303_v6 }
  0xe7   : > { %v1728_v31 = vsel %vm754_vm2, 1.0, %v2027_v37  ;;  %v1729_v32 = vsel %vm755_vm3, 1.0, %v2027_v37  ;;  %v725_v33 = vpop.permute.xlu1 %724  ;;  %v536_v22 = vadd.f32 %v535_v17, %v534_v63  ;;  %v557_v23 = vadd.f32 %v556_v14, %v555_v0 }
  0xe8   : > { %v841_v36 = vadd.f32 %v1728_v31, %v840_v27  ;;  %v862_v38 = vadd.f32 %v1729_v32, %v861_v28  ;;  %vm760_vm4 = vcmp.eq.s32.totalorder %v725_v33, %v2300_v26  ;;  %vm761_vm5 = vcmp.eq.s32.totalorder %v725_v33, %v2303_v6 }
  0xe9   : > { %v722_v21 = vpop.permute.xlu0 %721  ;;  %v1734_v48 = vsel %vm760_vm4, 1.0, %v2027_v37  ;;  %v1735_v49 = vsel %vm761_vm5, 1.0, %v2027_v37  ;;  %v2028_v27 = vmov 1966171168   ;;  %v537_v32 = vrot.slane %v536_v22, 1 }
  0xea   : > { %v842_v41 = vadd.f32 %v1730_v39, %v841_v36  ;;  %v863_v42 = vadd.f32 %v1731_v40, %v862_v38  ;;  %vm758_vm6 = vcmp.eq.s32.totalorder %v722_v21, %v2300_v26  ;;  %vm759_vm7 = vcmp.eq.s32.totalorder %v722_v21, %v2303_v6 }
  0xeb   : > { %v1732_v43 = vsel %vm758_vm6, 1.0, %v2027_v37  ;;  %v1733_v44 = vsel %vm759_vm7, 1.0, %v2027_v37  ;;  %v731_v47 = vpop.permute.xlu1 %730  ;;  %v882_v28 = vunpack.c.l.s4 %v2028_v27  ;;  %v558_v33 = vrot.slane %v557_v23, 1 }
  0xec   : > { %v843_v45 = vadd.f32 %v1732_v43, %v842_v41  ;;  %v864_v46 = vadd.f32 %v1733_v44, %v863_v42  ;;  %vm764_vm8 = vcmp.eq.s32.totalorder %v731_v47, %v2300_v26  ;;  %vm765_vm9 = vcmp.eq.s32.totalorder %v731_v47, %v2303_v6 }
  0xed   : > { %v1738_v59 = vsel %vm764_vm8, 1.0, %v2027_v37  ;;  %v1739_v60 = vsel %vm765_vm9, 1.0, %v2027_v37  ;;  %v883_v38 = vunpack.c.0.s8 %v882_v28  ;;  %v885_v39 = vshrl.u32 %v209_v20, 7 }
  0xee   : > { %v844_v52 = vadd.f32 %v1734_v48, %v843_v45  ;;  %v865_v53 = vadd.f32 %v1735_v49, %v864_v46  ;;  %v728_v54 = vpop.permute.xlu0 %727  ;;  %v538_v42 = vadd.f32 %v537_v32, %v536_v22  ;;  %v559_v43 = vadd.f32 %v558_v33, %v557_v23 }
  0xef   : > { %vm762_vm10 = vcmp.eq.s32.totalorder %v728_v54, %v2300_v26  ;;  %vm763_vm11 = vcmp.eq.s32.totalorder %v728_v54, %v2303_v6  ;;  %v2478_v47 = vsub.s32 %v883_v38, %v885_v39  ;;  %vm2495_vm3 = vcmp.lt.s32.totalorder %v209_v20, 256 }
  0xf0   : > { %v1736_v55 = vsel %vm762_vm10, 1.0, %v2027_v37  ;;  %v1737_v56 = vsel %vm763_vm11, 1.0, %v2027_v37 }
  0xf1   : > { %v845_v57 = vadd.f32 %v1736_v55, %v844_v52  ;;  %v866_v58 = vadd.f32 %v1737_v56, %v865_v53 }
  0xf2   : > { %v737_v61 = vpop.permute.xlu1 %736  ;;  %v734_v62 = vpop.permute.xlu0 %733 }
  0xf3   : > { %v846_v1 = vadd.f32 %v1738_v59, %v845_v57  ;;  %v867_v3 = vadd.f32 %v1739_v60, %v866_v58  ;;  %vm768_vm12 = vcmp.eq.s32.totalorder %v737_v61, %v2300_v26  ;;  %vm769_vm13 = vcmp.eq.s32.totalorder %v737_v61, %v2303_v6 }
  0xf4   : > { %vm766_vm14 = vcmp.eq.s32.totalorder %v734_v62, %v2300_v26  ;;  %vm767_vm15 = vcmp.eq.s32.totalorder %v734_v62, %v2303_v6  ;;  %v1742_v12 = vsel %vm768_vm12, 1.0, %v2027_v37  ;;  %v1743_v13 = vsel %vm769_vm13, 1.0, %v2027_v37 }
  0xf5   : > { %v1740_v4 = vsel %vm766_vm14, 1.0, %v2027_v37  ;;  %v1741_v5 = vsel %vm767_vm15, 1.0, %v2027_v37 }
  0xf6   : > { %v847_v7 = vadd.f32 %v1740_v4, %v846_v1  ;;  %v868_v9 = vadd.f32 %v1741_v5, %v867_v3  ;;  %v1068_v10 = vpop.permute.xlu1 %1067  ;;  %v2469_v11 = vpop.permute.xlu0 %1064 }
  0xf7   : > { %vm1113_vm0 = vcmp.eq.s32.totalorder %v1068_v10, %v2300_v26  ;;  %vm1114_vm4 = vcmp.eq.s32.totalorder %v1068_v10, %v2303_v6  ;;  %vm1111_vm5 = vcmp.eq.s32.totalorder %v2469_v11, %v2300_v26  ;;  %vm1112_vm6 = vcmp.eq.s32.totalorder %v2469_v11, %v2303_v6 }
  0xf8   : > { %v848_v2 = vadd.f32 %v1742_v12, %v847_v7  ;;  %v869_v15 = vadd.f32 %v1743_v13, %v868_v9  ;;  %v1778_v59 = vsel %vm1113_vm0, 1.0, %v2027_v37  ;;  %v1779_v60 = vsel %vm1114_vm4, 1.0, %v2027_v37 }
  0xf9   : > { %v1776_v61 = vsel %vm1111_vm5, 1.0, %v2027_v37  ;;  %v1777_v62 = vsel %vm1112_vm6, 1.0, %v2027_v37 }
  0xfa   : > { %v849_v16 = vrot.slane %v848_v2, 4  ;;  %v870_v8 = vrot.slane %v869_v15, 4  ;;  %v1379_v18 = vpop.permute.xlu1 %1378  ;;  %v2473_v19 = vpop.permute.xlu0 %1070  ;;  %v1207_v5 = vadd.f32 %v1778_v59, %v1776_v61  ;;  %v1228_v7 = vadd.f32 %v1779_v60, %v1777_v62 }
  0xfb   : > { %vm1425_vm7 = vcmp.eq.s32.totalorder %v1379_v18, %v2300_v26  ;;  %vm1426_vm8 = vcmp.eq.s32.totalorder %v1379_v18, %v2303_v6  ;;  %vm1115_vm9 = vcmp.eq.s32.totalorder %v2473_v19, %v2300_v26  ;;  %vm1116_vm10 = vcmp.eq.s32.totalorder %v2473_v19, %v2303_v6 }
  0xfc   : > { %v850_v24 = vadd.f32 %v849_v16, %v848_v2  ;;  %v871_v25 = vadd.f32 %v870_v8, %v869_v15  ;;  %v1808_v63 = vsel %vm1425_vm7, 1.0, %v2027_v37  ;;  %v1809_v0 = vsel %vm1426_vm8, 1.0, %v2027_v37 }
  0xfd   : > { %v1780_v10 = vsel %vm1115_vm9, 1.0, %v2027_v37  ;;  %v1781_v11 = vsel %vm1116_vm10, 1.0, %v2027_v37 }
  0xfe   : > { %v851_v29 = vrot.slane %v850_v24, 2  ;;  %v872_v30 = vrot.slane %v871_v25, 2  ;;  %v1208_v15 = vadd.f32 %v1780_v10, %v1207_v5  ;;  %v1229_v16 = vadd.f32 %v1781_v11, %v1228_v7 }
  0xff   : > { %v1385_v31 = vpop.permute.xlu1 %1384 }
 0x100   : > { %v852_v34 = vadd.f32 %v851_v29, %v850_v24  ;;  %v873_v35 = vadd.f32 %v872_v30, %v871_v25  ;;  %vm1429_vm11 = vcmp.eq.s32.totalorder %v1385_v31, %v2300_v26  ;;  %vm1430_vm12 = vcmp.eq.s32.totalorder %v1385_v31, %v2303_v6 }
 0x101   : > { %v1382_v36 = vpop.permute.xlu0 %1381  ;;  %v1812_v12 = vsel %vm1429_vm11, 1.0, %v2027_v37  ;;  %v1813_v13 = vsel %vm1430_vm12, 1.0, %v2027_v37 }
 0x102   : > { %v853_v40 = vrot.slane %v852_v34, 1  ;;  %v874_v21 = vrot.slane %v873_v35, 1  ;;  %vm1427_vm1 = vcmp.eq.s32.totalorder %v1382_v36, %v2300_v26  ;;  %vm1428_vm2 = vcmp.eq.s32.totalorder %v1382_v36, %v2303_v6 }
 0x103   : > { %v2476_v41 = vpop.permute.xlu1 %1387  ;;  %v1810_v57 = vsel %vm1427_vm1, 1.0, %v2027_v37  ;;  %v1811_v20 = vsel %vm1428_vm2, 1.0, %v2027_v37 }
 0x104   : > { %v854_v44 = vadd.f32 %v853_v40, %v852_v34  ;;  %v875_v45 = vadd.f32 %v874_v21, %v873_v35  ;;  %v1521_v3 = vadd.f32 %v1810_v57, %v1808_v63  ;;  %v1542_v4 = vadd.f32 %v1811_v20, %v1809_v0 }
 0x105   : > { %v1074_v46 = vpop.permute.xlu0 %1073  ;;  %vm1431_vm13 = vcmp.eq.s32.totalorder %v2476_v41, %v2300_v26  ;;  %vm1432_vm14 = vcmp.eq.s32.totalorder %v2476_v41, %v2303_v6 }
 0x106   : > { %v876_v48 = vadd.f32 %v854_v44, %v538_v42  ;;  %v877_v49 = vadd.f32 %v875_v45, %v559_v43  ;;  %vm1117_vm15 = vcmp.eq.s32.totalorder %v1074_v46, %v2300_v26  ;;  %vm1118_vm0 = vcmp.eq.s32.totalorder %v1074_v46, %v2303_v6 }
 0x107   : > { %v1391_v50 = vpop.permute.xlu1 %1390  ;;  %v1522_v14 = vadd.f32 %v1812_v12, %v1521_v3  ;;  %v1543_v2 = vadd.f32 %v1813_v13, %v1542_v4  ;;  %v1814_v8 = vsel %vm1431_vm13, 1.0, %v2027_v37  ;;  %v1815_v18 = vsel %vm1432_vm14, 1.0, %v2027_v37 }
 0x108   : > { %v880_v51 = vcombine.low %v876_v48, %v877_v49  ;;  %vm1433_vm1 = vcmp.eq.s32.totalorder %v1391_v50, %v2300_v26  ;;  %vm1434_vm2 = vcmp.eq.s32.totalorder %v1391_v50, %v2303_v6  ;;  %v1782_v22 = vsel %vm1117_vm15, 1.0, %v2027_v37 }
 0x109   : > { %v2481_v52 = vpop.permute.xlu0 %1076  ;;  %v1783_v23 = vsel %vm1118_vm0, 1.0, %v2027_v37  ;;  %v1816_v24 = vsel %vm1433_vm1, 1.0, %v2027_v37  ;;  %v1817_v25 = vsel %vm1434_vm2, 1.0, %v2027_v37  ;;  %v1523_v27 = vadd.f32 %v1814_v8, %v1522_v14 }
 0x10a   : > { %v887_v53 = vrot.slane %v880_v51, %v2478_v47  ;;  %vm1119_vm4 = vcmp.eq.s32.totalorder %v2481_v52, %v2300_v26  ;;  %vm1120_vm5 = vcmp.eq.s32.totalorder %v2481_v52, %v2303_v6  ;;  %v1544_v28 = vadd.f32 %v1815_v18, %v1543_v2 }
 0x10b   : > { %v2487_v54 = vpop.permute.xlu1 %1393  ;;  %v1209_v30 = vadd.f32 %v1782_v22, %v1208_v15  ;;  %v1230_v31 = vadd.f32 %v1783_v23, %v1229_v16  ;;  %v1784_v32 = vsel %vm1119_vm4, 1.0, %v2027_v37  ;;  %v1785_v33 = vsel %vm1120_vm5, 1.0, %v2027_v37 }
 0x10c   : > { %v894_v56 = vrot.slane %v887_v53, %v2478_v47  ;;  %vm1435_vm6 = vcmp.eq.s32.totalorder %v2487_v54, %v2300_v26  ;;  %vm1436_vm7 = vcmp.eq.s32.totalorder %v2487_v54, %v2303_v6  ;;  %v1524_v34 = vadd.f32 %v1816_v24, %v1523_v27 }
 0x10d   : > { %v1545_v35 = vadd.f32 %v1817_v25, %v1544_v28  ;;  %v1818_v36 = vsel %vm1435_vm6, 1.0, %v2027_v37  ;;  %v1819_v38 = vsel %vm1436_vm7, 1.0, %v2027_v37  ;;  %v1210_v41 = vadd.f32 %v1784_v32, %v1209_v30 }
 0x10e   : > { %v1080_v58 = vpop.permute.xlu0 %1079  ;;  %900 = vst.msk [vmem:[%s2492_s7] ss:$2 sm:$0x3] %vm2495_vm3, %v894_v56  ;;  %v1231_v42 = vadd.f32 %v1785_v33, %v1230_v31  ;;  %v1525_v43 = vadd.f32 %v1818_v36, %v1524_v34 }
 0x10f   : > { %vm1121_vm8 = vcmp.eq.s32.totalorder %v1080_v58, %v2300_v26  ;;  %vm1122_vm9 = vcmp.eq.s32.totalorder %v1080_v58, %v2303_v6  ;;  %v1546_v44 = vadd.f32 %v1819_v38, %v1545_v35 }
 0x110   : > { %v2524_v1 = vpop.permute.xlu1 %1396  ;;  %v1786_v39 = vsel %vm1121_vm8, 1.0, %v2027_v37  ;;  %v1787_v40 = vsel %vm1122_vm9, 1.0, %v2027_v37 }
 0x111   : > { %vm1437_vm10 = vcmp.eq.s32.totalorder %v2524_v1, %v2300_v26  ;;  %vm1438_vm11 = vcmp.eq.s32.totalorder %v2524_v1, %v2303_v6  ;;  %v1211_v45 = vadd.f32 %v1786_v39, %v1210_v41  ;;  %v1232_v46 = vadd.f32 %v1787_v40, %v1231_v42 }
 0x112   : > { %v1083_v9 = vpop.permute.xlu0 %1082  ;;  %v1820_v48 = vsel %vm1437_vm10, 1.0, %v2027_v37  ;;  %v1821_v49 = vsel %vm1438_vm11, 1.0, %v2027_v37 }
 0x113   : > { %vm1123_vm12 = vcmp.eq.s32.totalorder %v1083_v9, %v2300_v26  ;;  %vm1124_vm13 = vcmp.eq.s32.totalorder %v1083_v9, %v2303_v6  ;;  %v1526_v57 = vadd.f32 %v1820_v48, %v1525_v43  ;;  %v1547_v20 = vadd.f32 %v1821_v49, %v1546_v44 }
 0x114   : > { %v1400_v17 = vpop.permute.xlu1 %1399  ;;  %v1788_v51 = vsel %vm1123_vm12, 1.0, %v2027_v37  ;;  %v1789_v52 = vsel %vm1124_vm13, 1.0, %v2027_v37 }
 0x115   : > { %vm1439_vm14 = vcmp.eq.s32.totalorder %v1400_v17, %v2300_v26  ;;  %vm1440_vm15 = vcmp.eq.s32.totalorder %v1400_v17, %v2303_v6  ;;  %v1212_v58 = vadd.f32 %v1788_v51, %v1211_v45  ;;  %v1233_v59 = vadd.f32 %v1789_v52, %v1232_v46 }
 0x116   : > { %v1086_v19 = vpop.permute.xlu0 %1085  ;;  %v1822_v54 = vsel %vm1439_vm14, 1.0, %v2027_v37  ;;  %v1823_v56 = vsel %vm1440_vm15, 1.0, %v2027_v37 }
 0x117   : > { %vm1125_vm0 = vcmp.eq.s32.totalorder %v1086_v19, %v2300_v26  ;;  %vm1126_vm1 = vcmp.eq.s32.totalorder %v1086_v19, %v2303_v6  ;;  %v1527_v63 = vadd.f32 %v1822_v54, %v1526_v57  ;;  %v1548_v0 = vadd.f32 %v1823_v56, %v1547_v20 }
 0x118   : > { %v1403_v29 = vpop.permute.xlu1 %1402  ;;  %v1790_v60 = vsel %vm1125_vm0, 1.0, %v2027_v37  ;;  %v1791_v61 = vsel %vm1126_vm1, 1.0, %v2027_v37 }
 0x119   : > { %vm1441_vm2 = vcmp.eq.s32.totalorder %v1403_v29, %v2300_v26  ;;  %vm1442_vm4 = vcmp.eq.s32.totalorder %v1403_v29, %v2303_v6  ;;  %v1213_v9 = vadd.f32 %v1790_v60, %v1212_v58  ;;  %v1234_v10 = vadd.f32 %v1791_v61, %v1233_v59 }
 0x11a   : > { %v1824_v1 = vsel %vm1441_vm2, 1.0, %v2027_v37  ;;  %v1825_v3 = vsel %vm1442_vm4, 1.0, %v2027_v37 }
 0x11b   : > { %v1528_v11 = vadd.f32 %v1824_v1, %v1527_v63  ;;  %v1549_v12 = vadd.f32 %v1825_v3, %v1548_v0 }
 0x11c   : > { %v1089_v21 = vpop.permute.xlu0 %1088 }
 0x11d   : > { %vm1127_vm5 = vcmp.eq.s32.totalorder %v1089_v21, %v2300_v26  ;;  %vm1128_vm6 = vcmp.eq.s32.totalorder %v1089_v21, %v2303_v6 }
 0x11e   : > { %v1792_v5 = vsel %vm1127_vm5, 1.0, %v2027_v37  ;;  %v1793_v7 = vsel %vm1128_vm6, 1.0, %v2027_v37 }
 0x11f   : > { %v1406_v50 = vpop.permute.xlu1 %1405  ;;  %v1214_v17 = vadd.f32 %v1792_v5, %v1213_v9  ;;  %v1235_v14 = vadd.f32 %v1793_v7, %v1234_v10 }
 0x120   : > { %v1092_v53 = vpop.permute.xlu0 %1091  ;;  %vm1443_vm7 = vcmp.eq.s32.totalorder %v1406_v50, %v2300_v26  ;;  %vm1444_vm8 = vcmp.eq.s32.totalorder %v1406_v50, %v2303_v6 }
 0x121   : > { %vm1129_vm9 = vcmp.eq.s32.totalorder %v1092_v53, %v2300_v26  ;;  %vm1130_vm10 = vcmp.eq.s32.totalorder %v1092_v53, %v2303_v6  ;;  %v1826_v2 = vsel %vm1443_vm7, 1.0, %v2027_v37  ;;  %v1827_v15 = vsel %vm1444_vm8, 1.0, %v2027_v37 }
 0x122   : > { %v1794_v8 = vsel %vm1129_vm9, 1.0, %v2027_v37  ;;  %v1795_v18 = vsel %vm1130_vm10, 1.0, %v2027_v37  ;;  %v1529_v23 = vadd.f32 %v1826_v2, %v1528_v11  ;;  %v1550_v24 = vadd.f32 %v1827_v15, %v1549_v12 }
 0x123   : > { %v1409_v62 = vpop.permute.xlu1 %1408  ;;  %v1215_v25 = vadd.f32 %v1794_v8, %v1214_v17  ;;  %v1236_v27 = vadd.f32 %v1795_v18, %v1235_v14 }
 0x124   : > { %v1095_v4 = vpop.permute.xlu0 %1094  ;;  %vm1445_vm11 = vcmp.eq.s32.totalorder %v1409_v62, %v2300_v26  ;;  %vm1446_vm12 = vcmp.eq.s32.totalorder %v1409_v62, %v2303_v6 }
 0x125   : > { %vm1131_vm13 = vcmp.eq.s32.totalorder %v1095_v4, %v2300_v26  ;;  %vm1132_vm14 = vcmp.eq.s32.totalorder %v1095_v4, %v2303_v6  ;;  %v1828_v19 = vsel %vm1445_vm11, 1.0, %v2027_v37  ;;  %v1829_v22 = vsel %vm1446_vm12, 1.0, %v2027_v37 }
 0x126   : > { %v1796_v28 = vsel %vm1131_vm13, 1.0, %v2027_v37  ;;  %v1797_v29 = vsel %vm1132_vm14, 1.0, %v2027_v37  ;;  %v1530_v30 = vadd.f32 %v1828_v19, %v1529_v23  ;;  %v1551_v31 = vadd.f32 %v1829_v22, %v1550_v24 }
 0x127   : > { %v1412_v13 = vpop.permute.xlu1 %1411  ;;  %v1216_v39 = vadd.f32 %v1796_v28, %v1215_v25  ;;  %v1237_v40 = vadd.f32 %v1797_v29, %v1236_v27 }
 0x128   : > { %v1098_v16 = vpop.permute.xlu0 %1097  ;;  %vm1447_vm15 = vcmp.eq.s32.totalorder %v1412_v13, %v2300_v26  ;;  %vm1448_vm0 = vcmp.eq.s32.totalorder %v1412_v13, %v2303_v6 }
 0x129   : > { %vm1133_vm1 = vcmp.eq.s32.totalorder %v1098_v16, %v2300_v26  ;;  %vm1134_vm2 = vcmp.eq.s32.totalorder %v1098_v16, %v2303_v6  ;;  %v1830_v32 = vsel %vm1447_vm15, 1.0, %v2027_v37  ;;  %v1831_v33 = vsel %vm1448_vm0, 1.0, %v2027_v37 }
 0x12a   : > { %v1798_v35 = vsel %vm1133_vm1, 1.0, %v2027_v37  ;;  %v1799_v36 = vsel %vm1134_vm2, 1.0, %v2027_v37  ;;  %v1531_v21 = vadd.f32 %v1830_v32, %v1530_v30  ;;  %v1552_v41 = vadd.f32 %v1831_v33, %v1551_v31 }
 0x12b   : > { %v1217_v42 = vadd.f32 %v1798_v35, %v1216_v39  ;;  %v1238_v43 = vadd.f32 %v1799_v36, %v1237_v40 }
 0x12d   : > { %v1415_v34 = vpop.permute.xlu1 %1414 }
 0x12e   : > { %vm1449_vm4 = vcmp.eq.s32.totalorder %v1415_v34, %v2300_v26  ;;  %vm1450_vm5 = vcmp.eq.s32.totalorder %v1415_v34, %v2303_v6  ;;  %v1101_v38 = vpop.permute.xlu0 %1100 }
 0x12f   : > { %vm1135_vm6 = vcmp.eq.s32.totalorder %v1101_v38, %v2300_v26  ;;  %vm1136_vm7 = vcmp.eq.s32.totalorder %v1101_v38, %v2303_v6  ;;  %v1832_v44 = vsel %vm1449_vm4, 1.0, %v2027_v37  ;;  %v1833_v45 = vsel %vm1450_vm5, 1.0, %v2027_v37 }
 0x130   : > { %v1800_v48 = vsel %vm1135_vm6, 1.0, %v2027_v37  ;;  %v1801_v49 = vsel %vm1136_vm7, 1.0, %v2027_v37  ;;  %v1532_v53 = vadd.f32 %v1832_v44, %v1531_v21  ;;  %v1553_v54 = vadd.f32 %v1833_v45, %v1552_v41 }
 0x131   : > { %v1418_v46 = vpop.permute.xlu1 %1417  ;;  %v1218_v56 = vadd.f32 %v1800_v48, %v1217_v42  ;;  %v1239_v57 = vadd.f32 %v1801_v49, %v1238_v43 }
 0x132   : > { %vm1451_vm8 = vcmp.eq.s32.totalorder %v1418_v46, %v2300_v26  ;;  %vm1452_vm9 = vcmp.eq.s32.totalorder %v1418_v46, %v2303_v6  ;;  %v1104_v50 = vpop.permute.xlu0 %1103 }
 0x133   : > { %v1834_v51 = vsel %vm1451_vm8, 1.0, %v2027_v37  ;;  %v1835_v52 = vsel %vm1452_vm9, 1.0, %v2027_v37  ;;  %vm1137_vm10 = vcmp.eq.s32.totalorder %v1104_v50, %v2300_v26  ;;  %vm1138_vm11 = vcmp.eq.s32.totalorder %v1104_v50, %v2303_v6 }
 0x134   : > { %v1802_v20 = vsel %vm1137_vm10, 1.0, %v2027_v37  ;;  %v1803_v58 = vsel %vm1138_vm11, 1.0, %v2027_v37  ;;  %v1533_v60 = vadd.f32 %v1834_v51, %v1532_v53  ;;  %v1554_v61 = vadd.f32 %v1835_v52, %v1553_v54 }
 0x135   : > { %v1421_v59 = vpop.permute.xlu1 %1420  ;;  %v1219_v1 = vadd.f32 %v1802_v20, %v1218_v56  ;;  %v1240_v3 = vadd.f32 %v1803_v58, %v1239_v57 }
 0x136   : > { %vm1453_vm12 = vcmp.eq.s32.totalorder %v1421_v59, %v2300_v26  ;;  %vm1454_vm13 = vcmp.eq.s32.totalorder %v1421_v59, %v2303_v6  ;;  %v1107_v62 = vpop.permute.xlu0 %1106 }
 0x137   : > { %v1836_v63 = vsel %vm1453_vm12, 1.0, %v2027_v37  ;;  %v1837_v0 = vsel %vm1454_vm13, 1.0, %v2027_v37  ;;  %vm1139_vm14 = vcmp.eq.s32.totalorder %v1107_v62, %v2300_v26  ;;  %vm1140_vm15 = vcmp.eq.s32.totalorder %v1107_v62, %v2303_v6 }
 0x138   : > { %v1804_v4 = vsel %vm1139_vm14, 1.0, %v2027_v37  ;;  %v1805_v5 = vsel %vm1140_vm15, 1.0, %v2027_v37  ;;  %v1534_v7 = vadd.f32 %v1836_v63, %v1533_v60  ;;  %v1555_v9 = vadd.f32 %v1837_v0, %v1554_v61 }
 0x139   : > { %v1424_v10 = vpop.permute.xlu1 %1423  ;;  %v1220_v11 = vadd.f32 %v1804_v4, %v1219_v1  ;;  %v1241_v12 = vadd.f32 %v1805_v5, %v1240_v3 }
 0x13a   : > { %vm1455_vm0 = vcmp.eq.s32.totalorder %v1424_v10, %v2300_v26  ;;  %vm1456_vm1 = vcmp.eq.s32.totalorder %v1424_v10, %v2303_v6  ;;  %v1110_v13 = vpop.permute.xlu0 %1109 }
 0x13b   : > { %v1838_v17 = vsel %vm1455_vm0, 1.0, %v2027_v37  ;;  %v1839_v14 = vsel %vm1456_vm1, 1.0, %v2027_v37  ;;  %vm1141_vm2 = vcmp.eq.s32.totalorder %v1110_v13, %v2300_v26  ;;  %vm1142_vm4 = vcmp.eq.s32.totalorder %v1110_v13, %v2303_v6 }
 0x13c   : > { %v1535_v2 = vadd.f32 %v1838_v17, %v1534_v7  ;;  %v1556_v15 = vadd.f32 %v1839_v14, %v1555_v9  ;;  %v1806_v16 = vsel %vm1141_vm2, 1.0, %v2027_v37  ;;  %v1807_v8 = vsel %vm1142_vm4, 1.0, %v2027_v37 }
 0x13d   : > { %v1221_v18 = vadd.f32 %v1806_v16, %v1220_v11  ;;  %v1242_v19 = vadd.f32 %v1807_v8, %v1241_v12 }
 0x13e   : > { %v1536_v22 = vrot.slane %v1535_v2, 4  ;;  %v1557_v23 = vrot.slane %v1556_v15, 4 }
 0x13f   : > { %v1222_v24 = vrot.slane %v1221_v18, 4  ;;  %v1243_v25 = vrot.slane %v1242_v19, 4 }
 0x140   : > { %v1537_v27 = vadd.f32 %v1536_v22, %v1535_v2  ;;  %v1558_v28 = vadd.f32 %v1557_v23, %v1556_v15 }
 0x141   : > { %v1223_v29 = vadd.f32 %v1222_v24, %v1221_v18  ;;  %v1244_v30 = vadd.f32 %v1243_v25, %v1242_v19 }
 0x142   : > { %v1538_v31 = vrot.slane %v1537_v27, 2  ;;  %v1559_v26 = vrot.slane %v1558_v28, 2 }
 0x143   : > { %v1224_v32 = vrot.slane %v1223_v29, 2  ;;  %v1245_v6 = vrot.slane %v1244_v30, 2 }
 0x144   : > { %v1539_v33 = vadd.f32 %v1538_v31, %v1537_v27  ;;  %v1560_v34 = vadd.f32 %v1559_v26, %v1558_v28 }
 0x145   : > { %v1225_v35 = vadd.f32 %v1224_v32, %v1223_v29  ;;  %v1246_v36 = vadd.f32 %v1245_v6, %v1244_v30 }
 0x146   : > { %v1540_v37 = vrot.slane %v1539_v33, 1  ;;  %v1561_v38 = vrot.slane %v1560_v34, 1 }
 0x147   : > { %v1226_v39 = vrot.slane %v1225_v35, 1  ;;  %v1247_v40 = vrot.slane %v1246_v36, 1 }
 0x148   : > { %v1541_v21 = vadd.f32 %v1540_v37, %v1539_v33  ;;  %v1562_v41 = vadd.f32 %v1561_v38, %v1560_v34 }
 0x149   : > { %v1227_v42 = vadd.f32 %v1226_v39, %v1225_v35  ;;  %v1248_v43 = vadd.f32 %v1247_v40, %v1246_v36 }
 0x14b   : > { %v1563_v44 = vadd.f32 %v1541_v21, %v1227_v42  ;;  %v1564_v45 = vadd.f32 %v1562_v41, %v1248_v43 }
 0x14d   : > { %v1567_v46 = vcombine.low %v1563_v44, %v1564_v45 }
 0x14f   : > { %v1574_v48 = vrot.slane %v1567_v46, %v2478_v47 }
 0x151   : > { %v1581_v49 = vrot.slane %v1574_v48, %v2478_v47 }
 0x153   : > { %1840 = vst.msk [vmem:[%s2492_s7 + $0x1] ss:$2 sm:$0x3] %vm2495_vm3, %v1581_v49 }
 0x154 PF: > { %s14_s12 = sadd.s32 1, %s2023_s12  }
 0x155   : > { %p11_p1 = scmp.ge.s32.totalorder %s14_s12, 4  }
 0x157   :  { %13 = sbr.rel (!%p11_p1) target bundleno = 1 (0x1), region = 73 }
 0x15e   :  { %1606 = vsyncpa [#allocation3], 1 }
 0x15f   :  { %1608 = vsyncpa [#allocation3 + $0x1], 1 }

</bundles_post_ra>
